<compile_context>
chip_gen: v7x
topology: tpu7x:2x2x1
jax: 0.10.0
libtpu: 0.0.40
codegen_flags: <defaults>
</compile_context>

<pallas_src>
import functools

import jax
import jax.numpy as jnp
from jax.experimental import pallas as pl
from jax.experimental.pallas import tpu as pltpu


# ----------------------------------------------------------------------------
# Kernel: one (batch element, output-row tile) per grid step.
# ----------------------------------------------------------------------------
def _bottleneck_kernel(x_ref, w1_ref, t1_ref, wd_ref, t2_ref, w3_ref, t3_ref,
                       o_ref, *, stride, tile_oh, add_residual, h_in, w_in):
    Wp = x_ref.shape[2]
    Cin = x_ref.shape[3]
    Cexp = w1_ref.shape[1]
    Cout = w3_ref.shape[1]
    W_out = o_ref.shape[2]

    R_in = tile_oh * stride + 2          # padded-h rows needed (incl. 1-row halos)
    R_acc = tile_oh * stride             # stride-1 depthwise rows computed
    W_acc = W_out * stride               # stride-1 depthwise cols computed

    j = pl.program_id(1)
    step_rows = tile_oh * stride
    start = j * step_rows                # first padded row of this tile's window
    if step_rows % 8 == 0:
        start = pl.multiple_of(start, 8)

    # ---- row-tile + halo slab of the (small, pre-expansion) padded input ------
    xs = x_ref[0, pl.ds(start, R_in), :, :]            # (R_in, Wp, Cin)  bf16

    # ---- 1x1 expand conv (BN scale pre-folded) + ReLU6 on the MXU -------------
    h = jnp.dot(xs.reshape(R_in * Wp, Cin), w1_ref[...],
                preferred_element_type=jnp.float32)     # (R_in*Wp, Cexp) f32 acc
    h = jnp.clip(h + t1_ref[...], 0.0, 6.0).reshape(R_in, Wp, Cexp)

    # Re-zero the 1px padding border so it behaves as the depthwise conv's zero
    # padding (ReLU6(bias) != 0 there).  In-kernel iota mask: no extra HBM input.
    row = start + jax.lax.broadcasted_iota(jnp.int32, (R_in, Wp, 1), 0)
    col = jax.lax.broadcasted_iota(jnp.int32, (R_in, Wp, 1), 1)
    valid = (row >= 1) & (row <= h_in) & (col >= 1) & (col <= w_in)
    h = jnp.where(valid, h, 0.0)

    # ---- 3x3 depthwise conv (BN scale pre-folded) + ReLU6 on the VPU ----------
    acc = jnp.zeros((R_acc, W_acc, Cexp), jnp.float32)
    for dy in range(3):
        for dx in range(3):
            acc = acc + h[dy:dy + R_acc, dx:dx + W_acc, :] * wd_ref[dy, dx, :]
    d = jnp.clip(acc + t2_ref[...], 0.0, 6.0)

    # ---- in-kernel spatial subsampling for stride > 1 (before the projection) -
    if stride > 1:
        # rows: split the leading dim and keep phase 0 (layout-trivial reshape)
        d = d.reshape(tile_oh, stride, W_acc, Cexp)[:, 0]
        # cols: unit-stride slices + concat (safe; see TODO above)
        d = jnp.concatenate(
            [d[:, ox * stride:ox * stride + 1, :] for ox in range(W_out)],
            axis=1)                                     # (tile_oh, W_out, Cexp)

    # ---- 1x1 project conv (BN scale pre-folded) on the MXU --------------------
    o = jnp.dot(d.reshape(tile_oh * W_out, Cexp).astype(w3_ref.dtype), w3_ref[...],
                preferred_element_type=jnp.float32)
    o = (o + t3_ref[...]).reshape(tile_oh, W_out, Cout)

    if add_residual:   # static; only when stride == 1 and Cin == Cout
        o = o + xs[1:1 + tile_oh, 1:1 + W_out, :].astype(jnp.float32)

    o_ref[0] = o.astype(o_ref.dtype)


# ----------------------------------------------------------------------------
# Tile-size heuristic: largest divisor of H_out whose f32 intermediates fit the
# per-step VMEM budget (kept well under the 32 MiB scoped default so the same
# tiling is safe on v7x's 64 MiB physical VMEM with double-buffered blocks).
# ----------------------------------------------------------------------------
def _choose_tile_oh(H_out, W_out, stride, Cexp, max_tile_oh=None,
                    budget_bytes=8 << 20):
    best = 1
    w_acc = W_out * stride
    for cand in range(1, H_out + 1):
        if H_out % cand:
            continue
        if max_tile_oh is not None and cand > max_tile_oh:
            break
        r_in = cand * stride + 2
        est = 4 * (r_in * (w_acc + 2) * Cexp          # h slab
                   + cand * stride * w_acc * Cexp     # depthwise accumulator
                   + cand * W_out * Cexp)             # subsampled d
        if est <= budget_bytes:
            best = cand
    return best


# ----------------------------------------------------------------------------
# NHWC core (preferred entry point inside a full NHWC network).
# ----------------------------------------------------------------------------
def linear_bottleneck_nhwc(x_nhwc, prepared, stride, in_channels, out_channels,
                           max_tile_oh=None):
    w1, t1, wd, t2, w3, t3 = prepared
    N, H, W, Cin = x_nhwc.shape
    Cexp, Cout = w1.shape[1], w3.shape[1]
    H_out = (H - 1) // stride + 1
    W_out = (W - 1) // stride + 1
    add_residual = (stride == 1 and in_channels == out_channels)

    tile_oh = _choose_tile_oh(H_out, W_out, stride, Cexp, max_tile_oh)
    num_row_tiles = H_out // tile_oh

    # Zero-pad the (small, pre-expansion) input once; the padded border rows/cols
    # are re-zeroed in-kernel AFTER the expand conv via the iota mask.
    Hp = H_out * stride + 2
    Wp = W_out * stride + 2
    xp = jnp.pad(x_nhwc.astype(jnp.bfloat16),
                 ((0, 0), (1, Hp - 1 - H), (1, Wp - 1 - W), (0, 0)))

    kernel = functools.partial(_bottleneck_kernel, stride=stride, tile_oh=tile_oh,
                               add_residual=add_residual, h_in=H, w_in=W)

    def rep(a):  # resident, replicated across the whole grid
        nd = a.ndim
        return pl.BlockSpec(a.shape, lambda n, j, _nd=nd: (0,) * _nd)

    out = pl.pallas_call(
        kernel,
        out_shape=jax.ShapeDtypeStruct((N, H_out, W_out, Cout), jnp.float32),
        grid=(N, num_row_tiles),
        in_specs=[
            pl.BlockSpec((1, Hp, Wp, Cin), lambda n, j: (n, 0, 0, 0)),  # resident per n
            rep(w1), rep(t1), rep(wd), rep(t2), rep(w3), rep(t3),
        ],
        out_specs=pl.BlockSpec((1, tile_oh, W_out, Cout), lambda n, j: (n, j, 0, 0)),
        compiler_params=pltpu.CompilerParams(
            dimension_semantics=("parallel", "parallel")),
    )(xp, w1, t1, wd, t2, w3, t3)
    return out


# ----------------------------------------------------------------------------
# NCHW adapter matching the PyTorch interface.
# (For a full network keep NHWC end-to-end and skip these transposes.)
# ----------------------------------------------------------------------------
def linear_bottleneck_forward(x_nchw, prepared, stride, in_channels, out_channels,
                              max_tile_oh=None):
    x = jnp.transpose(x_nchw, (0, 2, 3, 1))
    out = linear_bottleneck_nhwc(x, prepared, stride, in_channels, out_channels,
                                 max_tile_oh=max_tile_oh)
    return jnp.transpose(out, (0, 3, 1, 2))


# ----------------------------------------------------------------------------
# Parameter init (shapes as in the PyTorch module) + one-time preprocessing:
# fold eval-mode BN scale into conv weights, keep per-channel bias, cast to bf16.
# ----------------------------------------------------------------------------
def init_params(key, in_channels, out_channels, expand_t=6):
    Cin, Cexp, Cout = in_channels, in_channels * expand_t, out_channels
    ks = jax.random.split(key, 18)

    def nrm(k, shape, scale=0.1):
        return scale * jax.random.normal(k, shape, jnp.float32)

    # 1x1 convs stored as (Cin, Cout) matrices; depthwise 3x3 as (3, 3, Cexp)
    # (== torch weight[c, 0, dy, dx] with channels last).
    w1 = nrm(ks[0], (Cin, Cexp));  b1 = nrm(ks[1], (Cexp,))
    wd = nrm(ks[2], (3, 3, Cexp)); bd = nrm(ks[3], (Cexp,))
    w3 = nrm(ks[4], (Cexp, Cout)); b3 = nrm(ks[5], (Cout,))

    def bn(kg, kb, km, kv, c):
        return (1.0 + nrm(kg, (c,)), nrm(kb, (c,)), nrm(km, (c,)),
                1.0 + jnp.abs(nrm(kv, (c,))))

    g1, be1, m1, v1 = bn(*ks[6:10], Cexp)
    g2, be2, m2, v2 = bn(*ks[10:14], Cexp)
    g3, be3, m3, v3 = bn(*ks[14:18], Cout)
    return (w1, b1, g1, be1, m1, v1, wd, bd, g2, be2, m2, v2,
            w3, b3, g3, be3, m3, v3)


def prepare_params(raw, eps=1e-5):
    (w1, b1, g1, be1, m1, v1, wd, bd, g2, be2, m2, v2,
     w3, b3, g3, be3, m3, v3) = raw

    def fold(w, b, g, beta, mean, var):
        s = g / jnp.sqrt(var + eps)          # per-output-channel scale
        t = (b - mean) * s + beta            # remaining per-channel bias
        return w * s, t                      # scale broadcasts over last axis

    w1f, t1 = fold(w1, b1, g1, be1, m1, v1)
    wdf, t2 = fold(wd, bd, g2, be2, m2, v2)
    w3f, t3 = fold(w3, b3, g3, be3, m3, v3)
    return (w1f.astype(jnp.bfloat16), t1.reshape(1, -1).astype(jnp.float32),
            wdf.astype(jnp.float32),  t2.reshape(1, -1).astype(jnp.float32),
            w3f.astype(jnp.bfloat16), t3.reshape(1, -1).astype(jnp.float32))


# ----------------------------------------------------------------------------
# Pure-JAX reference (same math and same bf16 quantization points as the kernel).
# Differences vs. full-f32 math are the expected ~1e-2-level bf16 matmul effects.
# ----------------------------------------------------------------------------
def reference(x_nchw, prepared, stride, in_channels, out_channels):
    w1, t1, wd, t2, w3, t3 = prepared
    x = jnp.transpose(x_nchw, (0, 2, 3, 1)).astype(jnp.bfloat16)
    N, H, W, Cin = x.shape
    Cexp = w1.shape[1]

    h = jnp.einsum('nhwc,cd->nhwd', x, w1, preferred_element_type=jnp.float32)
    h = jnp.clip(h + t1, 0.0, 6.0)
    hp = jnp.pad(h, ((0, 0), (1, 1), (1, 1), (0, 0)))
    H_out = (H - 1) // stride + 1
    W_out = (W - 1) // stride + 1
    acc = jnp.zeros((N, H_out, W_out, Cexp), jnp.float32)
    for dy in range(3):
        for dx in range(3):
            acc = acc + hp[:, dy:dy + (H_out - 1) * stride + 1:stride,
                           dx:dx + (W_out - 1) * stride + 1:stride, :] * wd[dy, dx]
    d = jnp.clip(acc + t2, 0.0, 6.0).astype(jnp.bfloat16)
    o = jnp.einsum('nhwc,cd->nhwd', d, w3, preferred_element_type=jnp.float32) + t3
    if stride == 1 and in_channels == out_channels:
        o = o + x.astype(jnp.float32)
    return jnp.transpose(o, (0, 3, 1, 2))


if __name__ == "__main__":
    key = jax.random.PRNGKey(0)
    kx, kp, kx2, kp2 = jax.random.split(key, 4)

    # --- Test 1: stride=1, Cin == Cout -> residual path, 2 row tiles/image ----
    N, Cin, H, W, Cout, stride = 2, 4, 16, 16, 4, 1
    x = jax.random.normal(kx, (N, Cin, H, W), jnp.float32)
    prepared = prepare_params(init_params(kp, Cin, Cout, expand_t=6))
    out = jax.block_until_ready(
        linear_bottleneck_forward(x, prepared, stride, Cin, Cout, max_tile_oh=8))
    ref = reference(x, prepared, stride, Cin, Cout)
    assert out.shape == (N, Cout, H, W), out.shape
    assert jnp.allclose(out, ref, atol=1e-2, rtol=1e-2), \
        float(jnp.max(jnp.abs(out - ref)))

    # --- Test 2: stride=2, Cin != Cout -> in-kernel subsampling, no residual --
    Cout2, stride2 = 8, 2
    x2 = jax.random.normal(kx2, (N, Cin, H, W), jnp.float32)
    prepared2 = prepare_params(init_params(kp2, Cin, Cout2, expand_t=6))
    out2 = jax.block_until_ready(
        linear_bottleneck_forward(x2, prepared2, stride2, Cin, Cout2, max_tile_oh=4))
    ref2 = reference(x2, prepared2, stride2, Cin, Cout2)
    assert out2.shape == (N, Cout2, H // 2, W // 2), out2.shape
    assert jnp.allclose(out2, ref2, atol=1e-2, rtol=1e-2), \
        float(jnp.max(jnp.abs(out2 - ref2)))

    print("KERNEL_OK")
</pallas_src>

<mosaic_0001>
module attributes {stable_mosaic.version = 11 : i64} {
  func.func @_bottleneck_kernel(%arg0: i32, %arg1: i32, %arg2: memref<1x18x18x4xbf16, #tpu.memory_space<vmem>>, %arg3: memref<4x24xbf16, #tpu.memory_space<vmem>>, %arg4: memref<1x24xf32, #tpu.memory_space<vmem>>, %arg5: memref<3x3x24xf32, #tpu.memory_space<vmem>>, %arg6: memref<1x24xf32, #tpu.memory_space<vmem>>, %arg7: memref<24x4xbf16, #tpu.memory_space<vmem>>, %arg8: memref<1x4xf32, #tpu.memory_space<vmem>>, %arg9: memref<1x8x16x4xf32, #tpu.memory_space<vmem>>) attributes {dimension_semantics = [#tpu.dimension_semantics<parallel>, #tpu.dimension_semantics<parallel>], iteration_bounds = array<i64: 2, 2>, scalar_prefetch = 0 : i64, scratch_operands = 0 : i64, tpu.core_type = #tpu.core_type<tc>, window_params = [{transform_indices = @transform_0, window_bounds = array<i64: 1, 18, 18, 4>}, {pipeline_mode = #tpu.pipeline_mode<synchronous>, transform_indices = @transform_1, window_bounds = array<i64: 4, 24>}, {pipeline_mode = #tpu.pipeline_mode<synchronous>, transform_indices = @transform_2, window_bounds = array<i64: 1, 24>}, {pipeline_mode = #tpu.pipeline_mode<synchronous>, transform_indices = @transform_3, window_bounds = array<i64: 3, 3, 24>}, {pipeline_mode = #tpu.pipeline_mode<synchronous>, transform_indices = @transform_4, window_bounds = array<i64: 1, 24>}, {pipeline_mode = #tpu.pipeline_mode<synchronous>, transform_indices = @transform_5, window_bounds = array<i64: 24, 4>}, {pipeline_mode = #tpu.pipeline_mode<synchronous>, transform_indices = @transform_6, window_bounds = array<i64: 1, 4>}, {transform_indices = @transform_7, window_bounds = array<i64: 1, 8, 16, 4>}]} {
    %c8_i32 = arith.constant 8 : i32
    %0 = arith.muli %arg1, %c8_i32 : i32
    %1 = tpu.assume_multiple %0, 8 : i32
    %c0 = arith.constant 0 : index
    %2 = arith.index_cast %1 : i32 to index
    %c0_0 = arith.constant 0 : index
    %c0_1 = arith.constant 0 : index
    %3 = vector.load %arg2[%c0, %2, %c0_0, %c0_1] : memref<1x18x18x4xbf16, #tpu.memory_space<vmem>>, vector<1x10x18x4xbf16>
    %4 = vector.shape_cast %3 : vector<1x10x18x4xbf16> to vector<10x18x4xbf16>
    %5 = vector.shape_cast %4 : vector<10x18x4xbf16> to vector<180x4xbf16>
    %c0_2 = arith.constant 0 : index
    %c0_3 = arith.constant 0 : index
    %6 = vector.load %arg3[%c0_2, %c0_3] : memref<4x24xbf16, #tpu.memory_space<vmem>>, vector<4x24xbf16>
    %cst = arith.constant dense<0.000000e+00> : vector<180x24xf32>
    %7 = tpu.matmul %5, %6, %cst {dimension_numbers = #tpu.dot_dimension_numbers<[1], [0], [0], [1], [0, 0, 1, 1], [], []>} : vector<180x4xbf16>, vector<4x24xbf16>, vector<180x24xf32> -> vector<180x24xf32>
    %c0_4 = arith.constant 0 : index
    %c0_5 = arith.constant 0 : index
    %8 = vector.load %arg4[%c0_4, %c0_5] : memref<1x24xf32, #tpu.memory_space<vmem>>, vector<1x24xf32>
    %9 = vector.broadcast %8 : vector<1x24xf32> to vector<180x24xf32>
    %10 = arith.addf %7, %9 : vector<180x24xf32>
    %cst_6 = arith.constant 0.000000e+00 : f32
    %cst_7 = arith.constant 6.000000e+00 : f32
    %11 = vector.broadcast %cst_6 : f32 to vector<180x24xf32>
    %12 = arith.maximumf %11, %10 : vector<180x24xf32>
    %13 = vector.broadcast %cst_7 : f32 to vector<180x24xf32>
    %14 = arith.minimumf %13, %12 : vector<180x24xf32>
    %15 = vector.shape_cast %14 : vector<180x24xf32> to vector<10x18x24xf32>
    %16 = tpu.iota {dimensions = array<i32: 0>} : vector<10x18x1xi32>
    %17 = vector.broadcast %1 : i32 to vector<10x18x1xi32>
    %18 = arith.addi %17, %16 : vector<10x18x1xi32>
    %19 = tpu.iota {dimensions = array<i32: 1>} : vector<10x18x1xi32>
    %c1_i32 = arith.constant 1 : i32
    %20 = vector.broadcast %c1_i32 : i32 to vector<10x18x1xi32>
    %21 = arith.cmpi sge, %18, %20 : vector<10x18x1xi32>
    %c16_i32 = arith.constant 16 : i32
    %22 = vector.broadcast %c16_i32 : i32 to vector<10x18x1xi32>
    %23 = arith.cmpi sle, %18, %22 : vector<10x18x1xi32>
    %24 = arith.andi %21, %23 : vector<10x18x1xi1>
    %c1_i32_8 = arith.constant 1 : i32
    %25 = vector.broadcast %c1_i32_8 : i32 to vector<10x18x1xi32>
    %26 = arith.cmpi sge, %19, %25 : vector<10x18x1xi32>
    %27 = arith.andi %24, %26 : vector<10x18x1xi1>
    %c16_i32_9 = arith.constant 16 : i32
    %28 = vector.broadcast %c16_i32_9 : i32 to vector<10x18x1xi32>
    %29 = arith.cmpi sle, %19, %28 : vector<10x18x1xi32>
    %30 = arith.andi %27, %29 : vector<10x18x1xi1>
    %cst_10 = arith.constant 0.000000e+00 : f32
    %31 = vector.shape_cast %30 : vector<10x18x1xi1> to vector<10x18x1xi1>
    %32 = vector.broadcast %31 : vector<10x18x1xi1> to vector<10x18x24xi1>
    %33 = vector.broadcast %cst_10 : f32 to vector<10x18x24xf32>
    %34 = arith.select %32, %15, %33 : vector<10x18x24xi1>, vector<10x18x24xf32>
    %cst_11 = arith.constant 0.000000e+00 : f32
    %35 = vector.broadcast %cst_11 : f32 to vector<8x16x24xf32>
    %36 = vector.extract_strided_slice %34 {offsets = [0, 0, 0], sizes = [8, 16, 24], strides = [1, 1, 1]} : vector<10x18x24xf32> to vector<8x16x24xf32>
    %c0_12 = arith.constant 0 : index
    %c0_13 = arith.constant 0 : index
    %c0_14 = arith.constant 0 : index
    %37 = vector.load %arg5[%c0_12, %c0_13, %c0_14] : memref<3x3x24xf32, #tpu.memory_space<vmem>>, vector<1x1x24xf32>
    %38 = vector.shape_cast %37 : vector<1x1x24xf32> to vector<24xf32>
    %39 = vector.shape_cast %38 : vector<24xf32> to vector<1x1x24xf32>
    %40 = vector.broadcast %39 : vector<1x1x24xf32> to vector<8x16x24xf32>
    %41 = arith.mulf %36, %40 : vector<8x16x24xf32>
    %42 = arith.addf %35, %41 : vector<8x16x24xf32>
    %43 = vector.extract_strided_slice %34 {offsets = [0, 1, 0], sizes = [8, 16, 24], strides = [1, 1, 1]} : vector<10x18x24xf32> to vector<8x16x24xf32>
    %c0_15 = arith.constant 0 : index
    %c1 = arith.constant 1 : index
    %c0_16 = arith.constant 0 : index
    %44 = vector.load %arg5[%c0_15, %c1, %c0_16] : memref<3x3x24xf32, #tpu.memory_space<vmem>>, vector<1x1x24xf32>
    %45 = vector.shape_cast %44 : vector<1x1x24xf32> to vector<24xf32>
    %46 = vector.shape_cast %45 : vector<24xf32> to vector<1x1x24xf32>
    %47 = vector.broadcast %46 : vector<1x1x24xf32> to vector<8x16x24xf32>
    %48 = arith.mulf %43, %47 : vector<8x16x24xf32>
    %49 = arith.addf %42, %48 : vector<8x16x24xf32>
    %50 = vector.extract_strided_slice %34 {offsets = [0, 2, 0], sizes = [8, 16, 24], strides = [1, 1, 1]} : vector<10x18x24xf32> to vector<8x16x24xf32>
    %c0_17 = arith.constant 0 : index
    %c2 = arith.constant 2 : index
    %c0_18 = arith.constant 0 : index
    %51 = vector.load %arg5[%c0_17, %c2, %c0_18] : memref<3x3x24xf32, #tpu.memory_space<vmem>>, vector<1x1x24xf32>
    %52 = vector.shape_cast %51 : vector<1x1x24xf32> to vector<24xf32>
    %53 = vector.shape_cast %52 : vector<24xf32> to vector<1x1x24xf32>
    %54 = vector.broadcast %53 : vector<1x1x24xf32> to vector<8x16x24xf32>
    %55 = arith.mulf %50, %54 : vector<8x16x24xf32>
    %56 = arith.addf %49, %55 : vector<8x16x24xf32>
    %57 = vector.extract_strided_slice %34 {offsets = [1, 0, 0], sizes = [8, 16, 24], strides = [1, 1, 1]} : vector<10x18x24xf32> to vector<8x16x24xf32>
    %c1_19 = arith.constant 1 : index
    %c0_20 = arith.constant 0 : index
    %c0_21 = arith.constant 0 : index
    %58 = vector.load %arg5[%c1_19, %c0_20, %c0_21] : memref<3x3x24xf32, #tpu.memory_space<vmem>>, vector<1x1x24xf32>
    %59 = vector.shape_cast %58 : vector<1x1x24xf32> to vector<24xf32>
    %60 = vector.shape_cast %59 : vector<24xf32> to vector<1x1x24xf32>
    %61 = vector.broadcast %60 : vector<1x1x24xf32> to vector<8x16x24xf32>
    %62 = arith.mulf %57, %61 : vector<8x16x24xf32>
    %63 = arith.addf %56, %62 : vector<8x16x24xf32>
    %64 = vector.extract_strided_slice %34 {offsets = [1, 1, 0], sizes = [8, 16, 24], strides = [1, 1, 1]} : vector<10x18x24xf32> to vector<8x16x24xf32>
    %c1_22 = arith.constant 1 : index
    %c1_23 = arith.constant 1 : index
    %c0_24 = arith.constant 0 : index
    %65 = vector.load %arg5[%c1_22, %c1_23, %c0_24] : memref<3x3x24xf32, #tpu.memory_space<vmem>>, vector<1x1x24xf32>
    %66 = vector.shape_cast %65 : vector<1x1x24xf32> to vector<24xf32>
    %67 = vector.shape_cast %66 : vector<24xf32> to vector<1x1x24xf32>
    %68 = vector.broadcast %67 : vector<1x1x24xf32> to vector<8x16x24xf32>
    %69 = arith.mulf %64, %68 : vector<8x16x24xf32>
    %70 = arith.addf %63, %69 : vector<8x16x24xf32>
    %71 = vector.extract_strided_slice %34 {offsets = [1, 2, 0], sizes = [8, 16, 24], strides = [1, 1, 1]} : vector<10x18x24xf32> to vector<8x16x24xf32>
    %c1_25 = arith.constant 1 : index
    %c2_26 = arith.constant 2 : index
    %c0_27 = arith.constant 0 : index
    %72 = vector.load %arg5[%c1_25, %c2_26, %c0_27] : memref<3x3x24xf32, #tpu.memory_space<vmem>>, vector<1x1x24xf32>
    %73 = vector.shape_cast %72 : vector<1x1x24xf32> to vector<24xf32>
    %74 = vector.shape_cast %73 : vector<24xf32> to vector<1x1x24xf32>
    %75 = vector.broadcast %74 : vector<1x1x24xf32> to vector<8x16x24xf32>
    %76 = arith.mulf %71, %75 : vector<8x16x24xf32>
    %77 = arith.addf %70, %76 : vector<8x16x24xf32>
    %78 = vector.extract_strided_slice %34 {offsets = [2, 0, 0], sizes = [8, 16, 24], strides = [1, 1, 1]} : vector<10x18x24xf32> to vector<8x16x24xf32>
    %c2_28 = arith.constant 2 : index
    %c0_29 = arith.constant 0 : index
    %c0_30 = arith.constant 0 : index
    %79 = vector.load %arg5[%c2_28, %c0_29, %c0_30] : memref<3x3x24xf32, #tpu.memory_space<vmem>>, vector<1x1x24xf32>
    %80 = vector.shape_cast %79 : vector<1x1x24xf32> to vector<24xf32>
    %81 = vector.shape_cast %80 : vector<24xf32> to vector<1x1x24xf32>
    %82 = vector.broadcast %81 : vector<1x1x24xf32> to vector<8x16x24xf32>
    %83 = arith.mulf %78, %82 : vector<8x16x24xf32>
    %84 = arith.addf %77, %83 : vector<8x16x24xf32>
    %85 = vector.extract_strided_slice %34 {offsets = [2, 1, 0], sizes = [8, 16, 24], strides = [1, 1, 1]} : vector<10x18x24xf32> to vector<8x16x24xf32>
    %c2_31 = arith.constant 2 : index
    %c1_32 = arith.constant 1 : index
    %c0_33 = arith.constant 0 : index
    %86 = vector.load %arg5[%c2_31, %c1_32, %c0_33] : memref<3x3x24xf32, #tpu.memory_space<vmem>>, vector<1x1x24xf32>
    %87 = vector.shape_cast %86 : vector<1x1x24xf32> to vector<24xf32>
    %88 = vector.shape_cast %87 : vector<24xf32> to vector<1x1x24xf32>
    %89 = vector.broadcast %88 : vector<1x1x24xf32> to vector<8x16x24xf32>
    %90 = arith.mulf %85, %89 : vector<8x16x24xf32>
    %91 = arith.addf %84, %90 : vector<8x16x24xf32>
    %92 = vector.extract_strided_slice %34 {offsets = [2, 2, 0], sizes = [8, 16, 24], strides = [1, 1, 1]} : vector<10x18x24xf32> to vector<8x16x24xf32>
    %c2_34 = arith.constant 2 : index
    %c2_35 = arith.constant 2 : index
    %c0_36 = arith.constant 0 : index
    %93 = vector.load %arg5[%c2_34, %c2_35, %c0_36] : memref<3x3x24xf32, #tpu.memory_space<vmem>>, vector<1x1x24xf32>
    %94 = vector.shape_cast %93 : vector<1x1x24xf32> to vector<24xf32>
    %95 = vector.shape_cast %94 : vector<24xf32> to vector<1x1x24xf32>
    %96 = vector.broadcast %95 : vector<1x1x24xf32> to vector<8x16x24xf32>
    %97 = arith.mulf %92, %96 : vector<8x16x24xf32>
    %98 = arith.addf %91, %97 : vector<8x16x24xf32>
    %c0_37 = arith.constant 0 : index
    %c0_38 = arith.constant 0 : index
    %99 = vector.load %arg6[%c0_37, %c0_38] : memref<1x24xf32, #tpu.memory_space<vmem>>, vector<1x24xf32>
    %100 = vector.shape_cast %99 : vector<1x24xf32> to vector<1x1x24xf32>
    %101 = vector.broadcast %100 : vector<1x1x24xf32> to vector<8x16x24xf32>
    %102 = arith.addf %98, %101 : vector<8x16x24xf32>
    %cst_39 = arith.constant 0.000000e+00 : f32
    %cst_40 = arith.constant 6.000000e+00 : f32
    %103 = vector.broadcast %cst_39 : f32 to vector<8x16x24xf32>
    %104 = arith.maximumf %103, %102 : vector<8x16x24xf32>
    %105 = vector.broadcast %cst_40 : f32 to vector<8x16x24xf32>
    %106 = arith.minimumf %105, %104 : vector<8x16x24xf32>
    %107 = vector.shape_cast %106 : vector<8x16x24xf32> to vector<128x24xf32>
    %108 = arith.truncf %107 : vector<128x24xf32> to vector<128x24xbf16>
    %c0_41 = arith.constant 0 : index
    %c0_42 = arith.constant 0 : index
    %109 = vector.load %arg7[%c0_41, %c0_42] : memref<24x4xbf16, #tpu.memory_space<vmem>>, vector<24x4xbf16>
    %cst_43 = arith.constant dense<0.000000e+00> : vector<128x4xf32>
    %110 = tpu.matmul %108, %109, %cst_43 {dimension_numbers = #tpu.dot_dimension_numbers<[1], [0], [0], [1], [0, 0, 1, 1], [], []>} : vector<128x24xbf16>, vector<24x4xbf16>, vector<128x4xf32> -> vector<128x4xf32>
    %c0_44 = arith.constant 0 : index
    %c0_45 = arith.constant 0 : index
    %111 = vector.load %arg8[%c0_44, %c0_45] : memref<1x4xf32, #tpu.memory_space<vmem>>, vector<1x4xf32>
    %112 = vector.broadcast %111 : vector<1x4xf32> to vector<128x4xf32>
    %113 = arith.addf %110, %112 : vector<128x4xf32>
    %114 = vector.shape_cast %113 : vector<128x4xf32> to vector<8x16x4xf32>
    %115 = vector.extract_strided_slice %4 {offsets = [1, 1, 0], sizes = [8, 16, 4], strides = [1, 1, 1]} : vector<10x18x4xbf16> to vector<8x16x4xbf16>
    %116 = arith.extf %115 : vector<8x16x4xbf16> to vector<8x16x4xf32>
    %117 = arith.addf %114, %116 : vector<8x16x4xf32>
    %c0_46 = arith.constant 0 : index
    %c0_47 = arith.constant 0 : index
    %c0_48 = arith.constant 0 : index
    %c0_49 = arith.constant 0 : index
    %118 = vector.load %arg9[%c0_46, %c0_47, %c0_48, %c0_49] : memref<1x8x16x4xf32, #tpu.memory_space<vmem>>, vector<1x8x16x4xf32>
    %119 = vector.shape_cast %118 : vector<1x8x16x4xf32> to vector<8x16x4xf32>
    %120 = vector.shape_cast %117 : vector<8x16x4xf32> to vector<1x8x16x4xf32>
    tpu.vector_store %arg9[%c0_46, %c0_47, %c0_48, %c0_49], %120 {strides = array<i32>} : memref<1x8x16x4xf32, #tpu.memory_space<vmem>>, vector<1x8x16x4xf32>,
    return
  }
  func.func @transform_0(%arg0: i32, %arg1: i32) -> (i32, i32, i32, i32) {
    %c0_i32 = arith.constant 0 : i32
    %c0_i32_0 = arith.constant 0 : i32
    %c0_i32_1 = arith.constant 0 : i32
    %c0_i32_2 = arith.constant 0 : i32
    return %arg0, %c0_i32, %c0_i32_0, %c0_i32_1 : i32, i32, i32, i32
  }
  func.func @transform_1(%arg0: i32, %arg1: i32) -> (i32, i32) {
    %c0_i32 = arith.constant 0 : i32
    %c0_i32_0 = arith.constant 0 : i32
    %c0_i32_1 = arith.constant 0 : i32
    return %c0_i32, %c0_i32_0 : i32, i32
  }
  func.func @transform_2(%arg0: i32, %arg1: i32) -> (i32, i32) {
    %c0_i32 = arith.constant 0 : i32
    %c0_i32_0 = arith.constant 0 : i32
    %c0_i32_1 = arith.constant 0 : i32
    return %c0_i32, %c0_i32_0 : i32, i32
  }
  func.func @transform_3(%arg0: i32, %arg1: i32) -> (i32, i32, i32) {
    %c0_i32 = arith.constant 0 : i32
    %c0_i32_0 = arith.constant 0 : i32
    %c0_i32_1 = arith.constant 0 : i32
    %c0_i32_2 = arith.constant 0 : i32
    return %c0_i32, %c0_i32_0, %c0_i32_1 : i32, i32, i32
  }
  func.func @transform_4(%arg0: i32, %arg1: i32) -> (i32, i32) {
    %c0_i32 = arith.constant 0 : i32
    %c0_i32_0 = arith.constant 0 : i32
    %c0_i32_1 = arith.constant 0 : i32
    return %c0_i32, %c0_i32_0 : i32, i32
  }
  func.func @transform_5(%arg0: i32, %arg1: i32) -> (i32, i32) {
    %c0_i32 = arith.constant 0 : i32
    %c0_i32_0 = arith.constant 0 : i32
    %c0_i32_1 = arith.constant 0 : i32
    return %c0_i32, %c0_i32_0 : i32, i32
  }
  func.func @transform_6(%arg0: i32, %arg1: i32) -> (i32, i32) {
    %c0_i32 = arith.constant 0 : i32
    %c0_i32_0 = arith.constant 0 : i32
    %c0_i32_1 = arith.constant 0 : i32
    return %c0_i32, %c0_i32_0 : i32, i32
  }
  func.func @transform_7(%arg0: i32, %arg1: i32) -> (i32, i32, i32, i32) {
    %c0_i32 = arith.constant 0 : i32
    %c0_i32_0 = arith.constant 0 : i32
    %c0_i32_1 = arith.constant 0 : i32
    return %arg0, %arg1, %c0_i32, %c0_i32_0 : i32, i32, i32, i32
  }
}

</mosaic_0001>

<bundles_post_ra>
// kernel: tpu_custom_call.1
= control target key start
LH: loop header
LB: loop body
LE: loop exit
PB: predicated region body
PF: predicated region fallthrough
CT: control target
= control target key end

     0   :  { %s4441_s24 = smov 0   ;;  %s4443_s25 = smov 0   ;;  %s6215_s0 = inlined_call_operand.vmem [shape: bf16[2,18,18,4], index: 0, kind: input, shape index: {}]   ;;  %s6216_s1 = inlined_call_operand.vmem [shape: bf16[4,24], index: 1, kind: input, shape index: {}]   ;;  %s6217_s2 = inlined_call_operand.vmem [shape: f32[1,24], index: 2, kind: input, shape index: {}]   ;;  %s6218_s3 = inlined_call_operand.vmem [shape: f32[3,3,24], index: 3, kind: input, shape index: {}]   ;;  %s6219_s4 = inlined_call_operand.vmem [shape: f32[1,24], index: 4, kind: input, shape index: {}]   ;;  %s6220_s5 = inlined_call_operand.vmem [shape: bf16[24,4], index: 5, kind: input, shape index: {}]   ;;  %s6221_s6 = inlined_call_operand.vmem [shape: f32[1,4], index: 6, kind: input, shape index: {}]   ;;  %s6222_s7 = inlined_call_operand.vmem [shape: f32[2,16,16,4], index: 7, kind: output, shape index: {}]  }
   0x1   :  { %s4445_s26 = smov 0   ;;  %s4447_s27 = smov 0  }
   0x2   :  { %s4449_s28 = smov 0  }
   0x3 LB: > { %s26_s29 = sadd.s32 1, %s4389_s26  ;;  %s29_s30 = sadd.s32 1, %s4393_s27  ;;  %s4397_s28 = sphi %s4449_s28, %s17_s28   ;;  %s4393_s27 = sphi %s4447_s27, %s6459_s27   ;;  %s4389_s26 = sphi %s4445_s26, %s6458_s26   ;;  %s4385_s25 = sphi %s4443_s25, %s6457_s25   ;;  %s4381_s24 = sphi %s4441_s24, %s6456_s24  }
   0x4   : > { %p27_p0 = scmp.ge.s32.totalorder %s26_s29, 2  ;;  %p4116_p1 = scmp.ge.s32.totalorder %s4397_s28, 1 }
   0x5   : > { %p251_p2 = scmp.lt.s32.totalorder %s4397_s28, 5 }
   0x6   : > { %s6461_s29 = smov (%p27_p0, %s26_s29), 0  ;;  %s6463_s30 = smov (!%p27_p0, %s29_s30), %s4393_s27 }
   0x7   : > { %p252_p3 = pnand %p4116_p1, %p251_p2  ;;  %p31_p4 = scmp.ge.s32.totalorder %s6463_s30, 2 }
   0x9   : > { %s6465_s30 = smov (%p31_p4, %s6463_s30), 0  ;;  %255 = sbr.rel (%p252_p3) target bundleno = 731 (0x2db), region = 48 }
  0x10   : > { %v989_v0 = vld [vmem:[%s6216_s1] sm:$0x3]  ;;  %vm1588_vm0 = vcmask 1041408   ;;  %p288_p5 = scmp.lt.s32.totalorder %s4385_s25, 1  ;;  %v380_v1 = vlaneseq  ;;  %v4399_v3 = vmov 1966171168  }
  0x11   : > { %4255 = vmatprep.subr.msk.bf16.mxu0 %vm1588_vm0, %v989_v0  ;;  %v1590_v2 = vsel %vm1588_vm0, %v989_v0, 0  ;;  %4256 = vmatprep.subr.msk.bf16.mxu1 %vm1588_vm0, %v989_v0  ;;  %v378_v4 = vunpack.c.l.s4 %v4399_v3  ;;  %s4183_s10 = smul.u32 96, %s4381_s24  ;;  %vm1551_vm1 = vcmask 31744   ;;  %s4651_s16 = sshll.u32 %s4381_s24, 3  ;;  %vm3783_vm4 = vcmask 1043456  }
  0x12   : > { %4208 = vmatpush3.bf16.msra.mxu0 %v1590_v2  ;;  %s6467_s25 = smov (!%p288_p5, %s4385_s25), 1  ;;  %v4478_v5 = vshrl.u32 %v380_v1, 7  ;;  %4254 = vmatpush3.bf16.msra.mxu1 %v1590_v2  ;;  %vm2901_vm0 = vcmask 1046528   ;;  %p296_p6 = scmp.lt.s32.totalorder %s4651_s16, 15 }
  0x13   : > { %s4258_s11 = smul.u32 216, %s6467_s25  ;;  %v379_v6 = vunpack.c.0.s8 %v378_v4  ;;  %s4120_s13 = sshll.u32 %s6467_s25, 5 }
  0x14   : > { %vm2215_vm7 = vcmp.ge.s32.totalorder %v4478_v5, 1 }
  0x15   : > { %s292_s14 = scalar_lea.vmem %s6215_s0, %s4258_s11  ;;  %v4486_v7 = vsub.s32 %v379_v6, %v4478_v5 }
  0x16   : > { %s4488_s15 = scalar_lea.vmem %s292_s14, %s4183_s10 }
  0x17   : > { %v4125_v8 = vld.sshfl [vmem:[%s4488_s15] sm:$0x33 pattern:$0x75316420] }
  0x18   : > { %v4335_v9 = vld.sshfl [vmem:[%s4488_s15 + $0xc] sm:$0x33 pattern:$0x75316420]  ;;  %v376_v11 = vcombine.high %v4125_v8, %v4125_v8  ;;  %v383_v12 = vrot.slane %v4125_v8, %v4486_v7 }
  0x19   : > { %v4126_v10 = vld.sshfl [vmem:[%s4488_s15 + $0x4] sm:$0x33 pattern:$0x75316420]  ;;  %v438_v20 = vcombine.high %v4335_v9, %v4335_v9  ;;  %v445_v21 = vrot.slane %v4335_v9, %v4486_v7 }
  0x1a   : > { %v4336_v13 = vld.sshfl [vmem:[%s4488_s15 + $0x10] sm:$0x33 pattern:$0x75316420]  ;;  %v400_v14 = vcombine.high %v4126_v10, %v4126_v10  ;;  %v407_v15 = vrot.slane %v4126_v10, %v4486_v7  ;;  %v390_v18 = vrot.slane %v376_v11, %v4486_v7 }
  0x1b   : > { %v4127_v16 = vld.sshfl [vmem:[%s4488_s15 + $0x8] sm:$0x1 pattern:$0x75316420]  ;;  %v462_v23 = vcombine.high %v4336_v13, %v4336_v13  ;;  %v469_v24 = vrot.slane %v4336_v13, %v4486_v7  ;;  %v452_v27 = vrot.slane %v438_v20, %v4486_v7  ;;  %v453_v28 = vcombine.high %v445_v21, %v445_v21 }
  0x1c   : > { %v4337_v17 = vld.sshfl [vmem:[%s4488_s15 + $0x14] sm:$0x1 pattern:$0x75316420]  ;;  %v430_v19 = vrot.slane %v4127_v16, %v4486_v7  ;;  %v414_v22 = vrot.slane %v400_v14, %v4486_v7  ;;  %v997_v25 = vcombine.low %v383_v12, %v390_v18  ;;  %v4132_v26 = vcombine.high %v383_v12, %v390_v18 }
  0x1d   : > { %v476_v31 = vrot.slane %v462_v23, %v4486_v7  ;;  %v477_v32 = vcombine.high %v469_v24, %v469_v24  ;;  %v454_v35 = vcombine.high %v452_v27, %v452_v27  ;;  %v1047_v39 = vcombine.low %v452_v27, %v453_v28  ;;  %v4338_v41 = vld.sshfl [vmem:[%s4488_s15 + $0x18] sm:$0x33 pattern:$0x75316420] }
  0x1e   : > { %v999_v29 = vcombine.low %v407_v15, %v414_v22  ;;  %v4133_v30 = vcombine.high %v407_v15, %v414_v22  ;;  %v1007_v33 = vrot.slane %v997_v25, %v4486_v7  ;;  %v1014_v34 = vrot.slane %v4132_v26, %v4486_v7  ;;  %v4339_v42 = vld.sshfl [vmem:[%s4488_s15 + $0x1c] sm:$0x33 pattern:$0x75316420] }
  0x1f   : > { %v1046_v36 = vcombine.low %v430_v19, %v445_v21  ;;  %v1049_v40 = vcombine.low %v476_v31, %v477_v32  ;;  %v1048_v44 = vcombine.low %v454_v35, %v469_v24  ;;  %v478_v46 = vcombine.high %v476_v31, %v476_v31  ;;  %v4340_v47 = vld.sshfl [vmem:[%s4488_s15 + $0x20] sm:$0x1 pattern:$0x75316420] }
  0x20   : > { %v1021_v37 = vrot.slane %v999_v29, %v4486_v7  ;;  %v1028_v38 = vrot.slane %v4133_v30, %v4486_v7  ;;  %v1029_v43 = vcombine.low %v1007_v33, %v1014_v34  ;;  %v1063_v49 = vrot.slane %v1047_v39, %v4486_v7  ;;  %v4341_v57 = vld.sshfl [vmem:[%s4488_s15 + $0x24] sm:$0x33 pattern:$0x75316420] }
  0x21   : > { %v1056_v45 = vrot.slane %v1046_v36, %v4486_v7  ;;  %v1077_v50 = vrot.slane %v1049_v40, %v4486_v7  ;;  %v492_v51 = vrot.slane %v4337_v17, %v4486_v7  ;;  %v1070_v53 = vrot.slane %v1048_v44, %v4486_v7  ;;  %v4342_v62 = vld.sshfl [vmem:[%s4488_s15 + $0x28] sm:$0x33 pattern:$0x75316420] }
  0x22   : > { %v1030_v48 = vcombine.low %v1021_v37, %v1028_v38  ;;  %v1037_v52 = vrot.slane %v1029_v43, %v4486_v7  ;;  %v500_v59 = vcombine.high %v4338_v41, %v4338_v41  ;;  %v507_v60 = vrot.slane %v4338_v41, %v4486_v7  ;;  %v4343_v63 = vld.sshfl [vmem:[%s4488_s15 + $0x2c] sm:$0x1 pattern:$0x75316420] }
  0x23   : > { %v1078_v55 = vcombine.low %v1056_v45, %v1063_v49  ;;  %v1095_v56 = vcombine.low %v478_v46, %v492_v51  ;;  %v1079_v58 = vcombine.low %v1070_v53, %v1077_v50  ;;  %v524_v61 = vcombine.high %v4339_v42, %v4339_v42  ;;  %v4344_v0 = vld.sshfl [vmem:[%s4488_s15 + $0x30] sm:$0x33 pattern:$0x75316420] }
  0x24   : > { %v1044_v54 = vrot.slane %v1030_v48, %v4486_v7  ;;  %v531_v3 = vrot.slane %v4339_v42, %v4486_v7  ;;  %v514_v8 = vrot.slane %v500_v59, %v4486_v7  ;;  %v554_v10 = vrot.slane %v4340_v47, %v4486_v7  ;;  %v4345_v39 = vld.sshfl [vmem:[%s4488_s15 + $0x34] sm:$0x33 pattern:$0x75316420] }
  0x25   : > { %v1086_v2 = vrot.slane %v1078_v55, %v4486_v7  ;;  %v1105_v4 = vrot.slane %v1095_v56, %v4486_v7  ;;  %v1093_v6 = vrot.slane %v1079_v58, %v4486_v7  ;;  %v538_v9 = vrot.slane %v524_v61, %v4486_v7  ;;  %v4346_v40 = vld.sshfl [vmem:[%s4488_s15 + $0x38] sm:$0x1 pattern:$0x75316420] }
  0x26   : > { %v1045_v1 = vcombine.low %v1037_v52, %v1044_v54  ;;  %v1096_v12 = vcombine.low %v507_v60, %v514_v8  ;;  %v4134_v13 = vcombine.high %v507_v60, %v514_v8  ;;  %v562_v15 = vcombine.high %v4341_v57, %v4341_v57  ;;  %v4347_v51 = vld.sshfl [vmem:[%s4488_s15 + $0x3c] sm:$0x33 pattern:$0x75316420] }
  0x27   : > { %v1094_v11 = vcombine.low %v1086_v2, %v1093_v6  ;;  %v1098_v14 = vcombine.low %v531_v3, %v538_v9  ;;  %v569_v16 = vrot.slane %v4341_v57, %v4486_v7  ;;  %v593_v17 = vrot.slane %v4342_v62, %v4486_v7  ;;  %v4348_v56 = vld.sshfl [vmem:[%s4488_s15 + $0x40] sm:$0x33 pattern:$0x75316420] }
  0x28   : > { %4209 = vmatprep.mubr.msk.bf16.mxu0 %vm1551_vm1, %v1045_v1  ;;  %v4135_v18 = vcombine.high %v531_v3, %v538_v9  ;;  %v1112_v19 = vrot.slane %v1096_v12, %v4486_v7  ;;  %v1119_v20 = vrot.slane %v4134_v13, %v4486_v7  ;;  %v586_v22 = vcombine.high %v4342_v62, %v4342_v62  ;;  %v4349_v57 = vld.sshfl [vmem:[%s4488_s15 + $0x44] sm:$0x1 pattern:$0x75316420] }
  0x29   : > { %4210 = vmatmul.mubr.msk.bf16.vlgmr.msra.gmra.mrb[0].mxu0 %vm1551_vm1, %v1094_v11  ;;  %v1126_v21 = vrot.slane %v1098_v14, %v4486_v7  ;;  %v576_v23 = vrot.slane %v562_v15, %v4486_v7  ;;  %v577_v24 = vcombine.high %v569_v16, %v569_v16  ;;  %v1145_v25 = vcombine.low %v554_v10, %v569_v16 }
  0x2a   : > { %v1154_v26 = vrot.slane %v4135_v18, %v4486_v7  ;;  %v1127_v27 = vcombine.low %v1105_v4, %v1112_v19  ;;  %v600_v29 = vrot.slane %v586_v22, %v4486_v7  ;;  %v601_v30 = vcombine.high %v593_v17, %v593_v17  ;;  %v4350_v19 = vld.sshfl [vmem:[%s4488_s15 + $0x48] sm:$0x33 pattern:$0x75316420] }
  0x2b   : > { %v1128_v28 = vcombine.low %v1119_v20, %v1126_v21  ;;  %v578_v31 = vcombine.high %v576_v23, %v576_v23  ;;  %v1146_v32 = vcombine.low %v576_v23, %v577_v24  ;;  %v1161_v33 = vrot.slane %v1145_v25, %v4486_v7  ;;  %v4351_v22 = vld.sshfl [vmem:[%s4488_s15 + $0x4c] sm:$0x33 pattern:$0x75316420] }
  0x2c   : > { %v616_v34 = vrot.slane %v4343_v63, %v4486_v7  ;;  %v1135_v35 = vrot.slane %v1127_v27, %v4486_v7  ;;  %v602_v37 = vcombine.high %v600_v29, %v600_v29  ;;  %v624_v38 = vcombine.high %v4344_v0, %v4344_v0  ;;  %v4352_v27 = vld.sshfl [vmem:[%s4488_s15 + $0x50] sm:$0x1 pattern:$0x75316420] }
  0x2d   : > { %v1142_v36 = vrot.slane %v1128_v28, %v4486_v7  ;;  %v1147_v41 = vcombine.low %v578_v31, %v593_v17  ;;  %v1168_v42 = vrot.slane %v1146_v32, %v4486_v7  ;;  %v1176_v43 = vcombine.low %v1154_v26, %v1161_v33 }
  0x2e   : > { %v631_v44 = vrot.slane %v4344_v0, %v4486_v7  ;;  %v638_v46 = vrot.slane %v624_v38, %v4486_v7  ;;  %v1193_v47 = vcombine.low %v600_v29, %v601_v30  ;;  %v1194_v48 = vcombine.low %v602_v37, %v616_v34  ;;  %v4353_v37 = vld.sshfl [vmem:[%s4488_s15 + $0x54] sm:$0x33 pattern:$0x75316420] }
  0x2f   : > { %v1143_v45 = vcombine.low %v1135_v35, %v1142_v36  ;;  %v1175_v49 = vrot.slane %v1147_v41, %v4486_v7  ;;  %v1184_v50 = vrot.slane %v1176_v43, %v4486_v7  ;;  %v648_v59 = vcombine.high %v4345_v39, %v4345_v39  ;;  %v4355_v43 = vld.sshfl [vmem:[%s4488_s15 + $0x5c] sm:$0x1 pattern:$0x75316420] }
  0x30   : > { %v1195_v52 = vcombine.low %v631_v44, %v638_v46  ;;  %v4136_v53 = vcombine.high %v631_v44, %v638_v46  ;;  %v1203_v54 = vrot.slane %v1193_v47, %v4486_v7  ;;  %v1210_v55 = vrot.slane %v1194_v48, %v4486_v7 }
  0x31   : > { %4213 = vmatprep.mubr.msk.bf16.mxu0 %vm1551_vm1, %v1143_v45  ;;  %v1177_v58 = vcombine.low %v1168_v42, %v1175_v49  ;;  %v655_v60 = vrot.slane %v4345_v39, %v4486_v7  ;;  %v678_v61 = vrot.slane %v4346_v40, %v4486_v7  ;;  %v662_v2 = vrot.slane %v648_v59, %v4486_v7  ;;  %v4354_v42 = vld.sshfl [vmem:[%s4488_s15 + $0x58] sm:$0x33 pattern:$0x75316420] }
  0x32   : > { %v1217_v62 = vrot.slane %v1195_v52, %v4486_v7  ;;  %v1224_v63 = vrot.slane %v4136_v53, %v4486_v7  ;;  %v1225_v0 = vcombine.low %v1203_v54, %v1210_v55  ;;  %v686_v6 = vcombine.high %v4347_v51, %v4347_v51 }
  0x33   : > { %v1191_v1 = vrot.slane %v1177_v58, %v4486_v7  ;;  %v693_v8 = vrot.slane %v4347_v51, %v4486_v7  ;;  %v1242_v10 = vcombine.low %v655_v60, %v662_v2  ;;  %v4137_v11 = vcombine.high %v655_v60, %v662_v2 }
  0x34   : > { %v1226_v3 = vcombine.low %v1217_v62, %v1224_v63  ;;  %v1233_v4 = vrot.slane %v1225_v0, %v4486_v7  ;;  %v710_v12 = vcombine.high %v4348_v56, %v4348_v56  ;;  %v700_v14 = vrot.slane %v686_v6, %v4486_v7  ;;  %v4356_v6 = vld.sshfl [vmem:[%s4488_s15 + $0x60] sm:$0x33 pattern:$0x75316420] }
  0x35   : > { %v1192_v9 = vcombine.low %v1184_v50, %v1191_v1  ;;  %v701_v15 = vcombine.high %v693_v8, %v693_v8  ;;  %v1244_v16 = vcombine.low %v678_v61, %v693_v8  ;;  %v1252_v17 = vrot.slane %v1242_v10, %v4486_v7 }
  0x36   : > { %v1240_v13 = vrot.slane %v1226_v3, %v4486_v7  ;;  %v1259_v18 = vrot.slane %v4137_v11, %v4486_v7  ;;  %v717_v20 = vrot.slane %v4348_v56, %v4486_v7  ;;  %v724_v21 = vrot.slane %v710_v12, %v4486_v7 }
  0x37   : > { %4214 = vmatmul.mubr.msk.bf16.gmra.mrb[4].mxu0 %vm1551_vm1, %v1192_v9  ;;  %v1245_v24 = vcombine.low %v700_v14, %v701_v15  ;;  %v1266_v25 = vrot.slane %v1244_v16, %v4486_v7  ;;  %v702_v26 = vcombine.high %v700_v14, %v700_v14  ;;  %v740_v31 = vrot.slane %v4349_v57, %v4486_v7 }
  0x38   : > { %v1241_v23 = vcombine.low %v1233_v4, %v1240_v13  ;;  %v1274_v28 = vcombine.low %v1252_v17, %v1259_v18  ;;  %v725_v29 = vcombine.high %v717_v20, %v717_v20  ;;  %v726_v30 = vcombine.high %v724_v21, %v724_v21 }
  0x39   : > { %v1273_v32 = vrot.slane %v1245_v24, %v4486_v7  ;;  %v1291_v33 = vcombine.low %v702_v26, %v717_v20  ;;  %v748_v39 = vcombine.high %v4350_v19, %v4350_v19  ;;  %v755_v40 = vrot.slane %v4350_v19, %v4486_v7  ;;  %v4357_v19 = vld.sshfl [vmem:[%s4488_s15 + $0x64] sm:$0x33 pattern:$0x75316420] }
  0x3a   : > { %4217 = vmatprep.mubr.msk.bf16.mxu0 %vm1551_vm1, %v1241_v23  ;;  %v1282_v34 = vrot.slane %v1274_v28, %v4486_v7  ;;  %v1292_v35 = vcombine.low %v724_v21, %v725_v29  ;;  %v1293_v36 = vcombine.low %v726_v30, %v740_v31  ;;  %v772_v46 = vcombine.high %v4351_v22, %v4351_v22  ;;  %v4358_v24 = vld.sshfl [vmem:[%s4488_s15 + $0x68] sm:$0x1 pattern:$0x75316420] }
  0x3b   : > { %v1275_v38 = vcombine.low %v1266_v25, %v1273_v32  ;;  %v1301_v41 = vrot.slane %v1291_v33, %v4486_v7  ;;  %v779_v47 = vrot.slane %v4351_v22, %v4486_v7  ;;  %v762_v49 = vrot.slane %v748_v39, %v4486_v7  ;;  %v4128_v32 = vld.sshfl [vmem:[%s4488_s15 + $0x6c] sm:$0x33 pattern:$0x75316420] }
  0x3c   : > { %v1308_v44 = vrot.slane %v1292_v35, %v4486_v7  ;;  %v1315_v45 = vrot.slane %v1293_v36, %v4486_v7  ;;  %v802_v50 = vrot.slane %v4352_v27, %v4486_v7  ;;  %v786_v52 = vrot.slane %v772_v46, %v4486_v7 }
  0x3d   : > { %v1289_v48 = vrot.slane %v1275_v38, %v4486_v7  ;;  %v1294_v54 = vcombine.low %v755_v40, %v762_v49  ;;  %v817_v55 = vrot.slane %v4353_v37, %v4486_v7  ;;  %v4138_v56 = vcombine.high %v755_v40, %v762_v49  ;;  %v4129_v40 = vld.sshfl [vmem:[%s4488_s15 + $0x70] sm:$0x33 pattern:$0x75316420] }
  0x3e   : > { %v1323_v51 = vcombine.low %v1301_v41, %v1308_v44  ;;  %v1341_v58 = vcombine.low %v779_v47, %v786_v52  ;;  %v4139_v59 = vcombine.high %v779_v47, %v786_v52  ;;  %v810_v60 = vcombine.high %v4353_v37, %v4353_v37 }
  0x3f   : > { %v1290_v53 = vcombine.low %v1282_v34, %v1289_v48  ;;  %v1322_v61 = vrot.slane %v1294_v54, %v4486_v7  ;;  %v1343_v62 = vcombine.low %v802_v50, %v817_v55  ;;  %v1350_v63 = vrot.slane %v4138_v56, %v4486_v7 }
  0x40   : > { %v1331_v57 = vrot.slane %v1323_v51, %v4486_v7  ;;  %v825_v0 = vcombine.high %v817_v55, %v817_v55  ;;  %v1357_v1 = vrot.slane %v1341_v58, %v4486_v7  ;;  %v1364_v2 = vrot.slane %v4139_v59, %v4486_v7 }
  0x41   : > { %4218 = vmatmul.mubr.msk.bf16.gmra.mrb[8].mxu0 %vm1551_vm1, %v1290_v53  ;;  %v824_v3 = vrot.slane %v810_v60, %v4486_v7  ;;  %v834_v4 = vcombine.high %v4354_v42, %v4354_v42  ;;  %v1324_v8 = vcombine.low %v1315_v45, %v1322_v61  ;;  %v1371_v9 = vrot.slane %v1343_v62, %v4486_v7  ;;  %v4130_v61 = vld.sshfl [vmem:[%s4488_s15 + $0x74] sm:$0x1 pattern:$0x75316420] }
  0x42   : > { %v841_v10 = vrot.slane %v4354_v42, %v4486_v7  ;;  %v864_v11 = vrot.slane %v4355_v43, %v4486_v7  ;;  %v1372_v12 = vcombine.low %v1350_v63, %v1357_v1  ;;  %v872_v28 = vcombine.high %v4356_v6, %v4356_v6 }
  0x43   : > { %v826_v13 = vcombine.high %v824_v3, %v824_v3  ;;  %v848_v14 = vrot.slane %v834_v4, %v4486_v7  ;;  %v1389_v15 = vcombine.low %v824_v3, %v825_v0  ;;  %v1338_v16 = vrot.slane %v1324_v8, %v4486_v7 }
  0x44   : > { %v1373_v17 = vcombine.low %v1364_v2, %v1371_v9  ;;  %v849_v18 = vcombine.high %v841_v10, %v841_v10  ;;  %v1380_v20 = vrot.slane %v1372_v12, %v4486_v7  ;;  %v879_v31 = vrot.slane %v4356_v6, %v4486_v7 }
  0x45   : > { %v850_v21 = vcombine.high %v848_v14, %v848_v14  ;;  %v1390_v22 = vcombine.low %v826_v13, %v841_v10  ;;  %v1399_v23 = vrot.slane %v1389_v15, %v4486_v7  ;;  %v1339_v25 = vcombine.low %v1331_v57, %v1338_v16 }
  0x46   : > { %v1387_v26 = vrot.slane %v1373_v17, %v4486_v7  ;;  %v1391_v27 = vcombine.low %v848_v14, %v849_v18  ;;  %v886_v35 = vrot.slane %v872_v28, %v4486_v7  ;;  %v896_v38 = vcombine.high %v4357_v19, %v4357_v19  ;;  %v4656_v28 = vld [vmem:[%s6217_s2] ss:$0 sm:$0xff] }
  0x47   : > { %v1392_v29 = vcombine.low %v850_v21, %v864_v11  ;;  %v1406_v30 = vrot.slane %v1390_v22, %v4486_v7  ;;  %4221 = vmatprep.mubr.msk.bf16.mxu0 %vm1551_vm1, %v1339_v25  ;;  %v903_v39 = vrot.slane %v4357_v19, %v4486_v7  ;;  %v926_v43 = vrot.slane %v4358_v24, %v4486_v7 }
  0x48   : > { %v1388_v33 = vcombine.low %v1380_v20, %v1387_v26  ;;  %v1413_v34 = vrot.slane %v1391_v27, %v4486_v7  ;;  %v1438_v41 = vcombine.low %v879_v31, %v886_v35  ;;  %v4140_v42 = vcombine.high %v879_v31, %v886_v35 }
  0x49   : > { %v1420_v36 = vrot.slane %v1392_v29, %v4486_v7  ;;  %v1421_v37 = vcombine.low %v1399_v23, %v1406_v30  ;;  %v934_v44 = vcombine.high %v4128_v32, %v4128_v32  ;;  %v910_v47 = vrot.slane %v896_v38, %v4486_v7  ;;  %v4301_v29 = vld [vmem:[%s6220_s5] sm:$0xff]   ;;  %v4302_v38 = vld [vmem:[%s6220_s5 + $0x8] ss:$0 sps:$4 sm:$0xff]  }
  0x4a   : > { %4222 = vmatmul.mubr.msk.bf16.gmra.mrb[12].mxu0 %vm1551_vm1, %v1388_v33  ;;  %v941_v48 = vrot.slane %v4128_v32, %v4486_v7  ;;  %v1448_v49 = vrot.slane %v1438_v41, %v4486_v7  ;;  %v1455_v50 = vrot.slane %v4140_v42, %v4486_v7  ;;  %v958_v52 = vcombine.high %v4129_v40, %v4129_v40 }
  0x4b   : > { %v1422_v45 = vcombine.low %v1413_v34, %v1420_v36  ;;  %v1429_v46 = vrot.slane %v1421_v37, %v4486_v7  ;;  %v948_v51 = vrot.slane %v934_v44, %v4486_v7  ;;  %v1440_v54 = vcombine.low %v903_v39, %v910_v47  ;;  %4233 = vmatprep.subr.bf16.mxu1 %v4301_v29 }
  0x4c   : > { %v4141_v55 = vcombine.high %v903_v39, %v910_v47  ;;  %v949_v56 = vcombine.high %v941_v48, %v941_v48  ;;  %v1470_v57 = vcombine.low %v1448_v49, %v1455_v50  ;;  %v965_v59 = vrot.slane %v4129_v40, %v4486_v7 }
  0x4d   : > { %v1436_v53 = vrot.slane %v1422_v45, %v4486_v7  ;;  %v950_v58 = vcombine.high %v948_v51, %v948_v51  ;;  %v972_v60 = vrot.slane %v958_v52, %v4486_v7  ;;  %v1462_v63 = vrot.slane %v1440_v54, %v4486_v7 }
  0x4e   : > { %v1469_v0 = vrot.slane %v4141_v55, %v4486_v7  ;;  %v1487_v1 = vcombine.low %v926_v43, %v941_v48  ;;  %v1478_v2 = vrot.slane %v1470_v57, %v4486_v7  ;;  %v973_v3 = vcombine.high %v965_v59, %v965_v59 }
  0x4f   : > { %v1437_v62 = vcombine.low %v1429_v46, %v1436_v53  ;;  %v1488_v4 = vcombine.low %v948_v51, %v949_v56  ;;  %v1489_v6 = vcombine.low %v950_v58, %v965_v59  ;;  %v974_v10 = vcombine.high %v972_v60, %v972_v60 }
  0x50   : > { %v1471_v8 = vcombine.low %v1462_v63, %v1469_v0  ;;  %v1497_v9 = vrot.slane %v1487_v1, %v4486_v7  ;;  %v988_v11 = vrot.slane %v4130_v61, %v4486_v7  ;;  %v1490_v12 = vcombine.low %v972_v60, %v973_v3 }
  0x51   : > { %4225 = vmatprep.mubr.msk.bf16.mxu0 %vm1551_vm1, %v1437_v62  ;;  %v1504_v13 = vrot.slane %v1488_v4, %v4486_v7  ;;  %v1511_v14 = vrot.slane %v1489_v6, %v4486_v7  ;;  %v4400_v26 = vmov 1983009808   ;;  %v4662_v30 = vstv %s4651_s16  ;;  %s6469_s16 = smov (!%p296_p6, %s4651_s16), 15 }
  0x52   : > { %v1485_v15 = vrot.slane %v1471_v8, %v4486_v7  ;;  %v1536_v16 = vcombine.low %v974_v10, %v988_v11  ;;  %v1518_v17 = vrot.slane %v1490_v12, %v4486_v7  ;;  %v1791_v27 = vunpack.c.l.s4 %v4400_v26  ;;  %v4715_v8 = vld [vmem:[%s6218_s3 + $0x1] ss:$0 sm:$0xff]  ;;  %s4119_s12 = sshll.u32 %s6469_s16, 1 }
  0x53   : > { %v1519_v18 = vcombine.low %v1497_v9, %v1504_v13  ;;  %v4665_v32 = vadd.s32 16, %v4478_v5  ;;  %v2172_v35 = vadd.s32 1, %v4662_v30  ;;  %vm2185_vm2 = vcmp.ge.s32.totalorder %v4662_v30, 1  ;;  %v4720_v9 = vld [vmem:[%s6218_s3 + $0x2] ss:$0 sm:$0xff]  ;;  %s300_s14 = sadd.s32 %s4120_s13, %s4119_s12 }
  0x54   : > { %v1486_v19 = vcombine.low %v1478_v2, %v1485_v15  ;;  %v1543_v20 = vrot.slane %v1536_v16, %v4486_v7  ;;  %v1520_v21 = vcombine.low %v1511_v14, %v1518_v17  ;;  %vm2195_vm3 = vcmp.le.s32.totalorder %v4662_v30, 16  ;;  %s4121_s25 = sshll.u32 %s300_s14, 3 }
  0x55   : > { %v1527_v22 = vrot.slane %v1519_v18, %v4486_v7  ;;  %vm2250_vm5 = vcmp.le.s32.totalorder %v4665_v32, 16  ;;  %v3785_v45 = vsel %vm3783_vm4, %v4302_v38, 0  ;;  %vm4685_vm6 = vmand %vm2185_vm2, %vm2195_vm3  ;;  %vm2186_vm8 = vcmp.ge.s32.totalorder %v2172_v35, 1  ;;  %s6119_s20 = scalar_lea.vmem %s6222_s7, %s4121_s25 }
  0x56   : > { %4226 = vmatmul.mubr.msk.bf16.gmra.mrb[16].mxu0 %vm1551_vm1, %v1486_v19  ;;  %v1534_v23 = vrot.slane %v1520_v21, %v4486_v7  ;;  %v1550_v24 = vrot.slane %v1543_v20, %v4486_v7  ;;  %v1792_v7 = vunpack.c.0.s8 %v1791_v27  ;;  %vm2196_vm9 = vcmp.le.s32.totalorder %v2172_v35, 16  ;;  %vm2253_vm10 = vmand %vm4685_vm6, %vm2250_vm5 }
  0x57   : > { %v4691_v51 = vadd.s32 2, %v4662_v30  ;;  %v4695_v55 = vadd.s32 3, %v4662_v30  ;;  %v4703_v59 = vadd.s32 4, %v4662_v30  ;;  %v4710_v3 = vadd.s32 5, %v4662_v30  ;;  %vm4733_vm11 = vmand %vm2186_vm8, %vm2196_vm9 }
  0x58   : > { %v1535_v25 = vcombine.low %v1527_v22, %v1534_v23  ;;  %v4676_v40 = vsub.s32 %v1792_v7, %v4478_v5  ;;  %v4723_v14 = vadd.s32 6, %v4662_v30  ;;  %v4726_v15 = vadd.s32 7, %v4662_v30  ;;  %vm4758_vm14 = vmand %vm4733_vm11, %vm2215_vm7  ;;  %v5623_v5 = vld [vmem:[%s6218_s3 + $0x8] ss:$0 sm:$0xff] }
  0x59   : > { %vm2187_vm12 = vcmp.ge.s32.totalorder %v4691_v51, 1  ;;  %vm2197_vm13 = vcmp.le.s32.totalorder %v4691_v51, 16  ;;  %vm4770_vm15 = vmand %vm4685_vm6, %vm2215_vm7  ;;  %vm3027_vm2 = vcmask 1045504   ;;  %vm2188_vm8 = vcmp.ge.s32.totalorder %v4695_v55, 1 }
  0x5a   : > { %4229 = vmatprep.mubr.msk.bf16.mxu1 %vm1551_vm1, %v1535_v25  ;;  %vm4840_vm3 = vmand %vm2187_vm12, %vm2197_vm13  ;;  %vm2198_vm9 = vcmp.le.s32.totalorder %v4695_v55, 16 }
  0x5b   : > { %4230 = vmatmul.mubr.msk.bf16.vlgmr.msra.gmra.mrb[0].mxu1 %vm1551_vm1, %v1550_v24  ;;  %v4747_v24 = vadd.s32 9, %v4662_v30  ;;  %vm4987_vm12 = vmand %vm2188_vm8, %vm2198_vm9  ;;  %vm2201_vm8 = vcmp.le.s32.totalorder %v4723_v14, 16  ;;  %vm2190_vm9 = vcmp.ge.s32.totalorder %v4710_v3, 1 }
  0x5c   : > { %4234 = vmatpush3.bf16.msra.mxu1 %v4301_v29  ;;  %vm2227_vm13 = vmand %vm4987_vm12, %vm2215_vm7 }
  0x5d   : > { %4257 = vmatprep.subr.msk.bf16.mxu1 %vm3783_vm4, %v4302_v38  ;;  %vm2259_vm4 = vmand %vm4840_vm3, %vm2250_vm5 }
  0x60   : > { %4236 = vmatpush3.bf16.msra.mxu1 %v3785_v45 }
  0xfc   : > { %v4211_v31 = vpop.f32.mrb[0].mxu0 }
  0xfd   : > { %v1635_v33 = vadd.f32 %v4211_v31, %v4656_v28  ;;  %v1626_v34 = vpop.f32.mrb[1].mxu0 }
  0xfe   : > { %v1627_v36 = vadd.f32 %v4656_v28, %v1626_v34  ;;  %v4212_v37 = vpop.f32.mrb[2].mxu0 }
  0xff   : > { %v1722_v39 = vmax.f32 %v1635_v33, 0.0  ;;  %v1638_v41 = vadd.f32 %v4212_v37, %v4656_v28  ;;  %v1629_v42 = vpop.f32.mrb[3].mxu0  ;;  %v4764_v37 = vadd.s32 8, %v4662_v30 }
 0x100   : > { %v1720_v43 = vmax.f32 %v1627_v36, 0.0  ;;  %v1630_v44 = vadd.f32 %v4656_v28, %v1629_v42 }
 0x101   : > { %v1745_v46 = vmin.f32 %v1722_v39, 6.0  ;;  %v1723_v48 = vmax.f32 %v1638_v41, 0.0 }
 0x102   : > { %v1743_v49 = vmin.f32 %v1720_v43, 6.0  ;;  %v1721_v50 = vmax.f32 %v1630_v44, 0.0 }
 0x103   : > { %v1823_v52 = vcombine.high %v1745_v46, %v1745_v46  ;;  %v1830_v53 = vrot.slane %v1745_v46, %v4676_v40  ;;  %v1746_v54 = vmin.f32 %v1723_v48, 6.0  ;;  %v4782_v48 = vld [vmem:[%s6218_s3] ss:$0 sm:$0xff] }
 0x104   : > { %v1789_v56 = vcombine.high %v1743_v49, %v1743_v49  ;;  %v1796_v57 = vrot.slane %v1743_v49, %v4676_v40  ;;  %v1744_v58 = vmin.f32 %v1721_v50, 6.0 }
 0x105   : > { %v1837_v60 = vrot.slane %v1823_v52, %v4676_v40  ;;  %v1838_v61 = vcombine.high %v1830_v53, %v1830_v53  ;;  %v2381_v62 = vrot.slane %v1830_v53, %v4676_v40  ;;  %v1840_v63 = vcombine.high %v1746_v54, %v1746_v54  ;;  %v4791_v53 = vld [vmem:[%s6218_s3 + $0x5] ss:$0 sm:$0xff] }
 0x106   : > { %v1803_v0 = vrot.slane %v1789_v56, %v4676_v40  ;;  %v1804_v1 = vcombine.high %v1796_v57, %v1796_v57  ;;  %v1847_v2 = vrot.slane %v1746_v54, %v4676_v40  ;;  %v1806_v11 = vcombine.high %v1744_v58, %v1744_v58 }
 0x107   : > { %v2382_v4 = vcombine.low %v1838_v61, %v1837_v60  ;;  %v2783_v6 = vsel %vm2253_vm10, %v2381_v62, 0.0  ;;  %v1839_v10 = vcombine.high %v1837_v60, %v1837_v60  ;;  %v4729_v16 = vrot.slane %v1840_v63, %v4676_v40  ;;  %v4805_v62 = vld [vmem:[%s6218_s3 + $0x4] ss:$0 sm:$0xff]  ;;  %v4810_v63 = vld [vmem:[%s6218_s3 + $0x6] ss:$0 sm:$0xff] }
 0x108   : > { %v1805_v12 = vcombine.high %v1803_v0, %v1803_v0  ;;  %v2341_v13 = vcombine.low %v1796_v57, %v1804_v1  ;;  %v1855_v17 = vcombine.high %v1847_v2, %v1847_v2  ;;  %v1813_v20 = vrot.slane %v1744_v58, %v4676_v40 }
 0x109   : > { %v2383_v19 = vcombine.low %v1839_v10, %v1847_v2  ;;  %v4739_v21 = vmul.f32 %v4715_v8, %v2783_v6  ;;  %v4742_v22 = vmul.f32 %v4720_v9, %v2783_v6  ;;  %v2390_v25 = vrot.slane %v2382_v4, %v4676_v40 }
 0x10a   : > { %v2342_v23 = vcombine.low %v1803_v0, %v1805_v12  ;;  %v1820_v27 = vrot.slane %v1806_v11, %v4676_v40  ;;  %v1821_v29 = vcombine.high %v1813_v20, %v1813_v20  ;;  %v4215_v7 = vpop.f32.mrb[4].mxu0  ;;  %v2349_v31 = vrot.slane %v2341_v13, %v4676_v40 }
 0x10b   : > { %v2397_v26 = vrot.slane %v2383_v19, %v4676_v40  ;;  %v1651_v35 = vadd.f32 %v4215_v7, %v4656_v28  ;;  %v1642_v36 = vpop.f32.mrb[5].mxu0  ;;  %v4775_v41 = vcombine.low %v1855_v17, %v4729_v16  ;;  %v2905_v45 = vrot.slane %v4739_v21, 1 }
 0x10c   : > { %v2356_v33 = vrot.slane %v2342_v23, %v4676_v40  ;;  %v1822_v42 = vcombine.high %v1820_v27, %v1820_v27  ;;  %v2358_v43 = vcombine.low %v1813_v20, %v1821_v29  ;;  %v4216_v44 = vpop.f32.mrb[6].mxu0  ;;  %v3031_v30 = vrot.slane %v4742_v22, 2 }
 0x10d   : > { %v2398_v39 = vcombine.low %v2390_v25, %v2397_v26  ;;  %v1856_v49 = vcombine.high %v4729_v16, %v4729_v16  ;;  %v1645_v50 = vpop.f32.mrb[7].mxu0  ;;  %v1726_v56 = vmax.f32 %v1651_v35, 0.0  ;;  %v1643_v57 = vadd.f32 %v4656_v28, %v1642_v36 }
 0x10e   : > { %v2357_v46 = vcombine.low %v2349_v31, %v2356_v33  ;;  %v2359_v54 = vcombine.low %v1820_v27, %v1822_v42  ;;  %v1654_v0 = vadd.f32 %v4216_v44, %v4656_v28  ;;  %v2407_v1 = vrot.slane %v4775_v41, %v4676_v40 }
 0x10f   : > { %v2784_v52 = vsel %vm4758_vm14, %v2398_v39, 0.0  ;;  %v2366_v4 = vrot.slane %v2358_v43, %v4676_v40  ;;  %v1646_v6 = vadd.f32 %v4656_v28, %v1645_v50  ;;  %v1749_v23 = vmin.f32 %v1726_v56, 6.0  ;;  %vm5035_vm14 = vmand %vm4840_vm3, %vm2215_vm7 }
 0x110   : > { %v2781_v58 = vsel %vm4770_vm15, %v2357_v46, 0.0  ;;  %v4797_v60 = vmul.f32 %v4715_v8, %v2784_v52  ;;  %v4800_v61 = vmul.f32 %v4720_v9, %v2784_v52  ;;  %v4816_v2 = vmul.f32 %v4782_v48, %v2784_v52 }
 0x111   : > { %v2816_v10 = vmul.f32 %v4782_v48, %v2781_v58  ;;  %v2853_v11 = vmul.f32 %v4715_v8, %v2781_v58  ;;  %v2979_v12 = vmul.f32 %v4720_v9, %v2781_v58  ;;  %v4824_v13 = vmul.f32 %v4791_v53, %v2784_v52 }
 0x112   : > { %v4827_v17 = vmul.f32 %v4805_v62, %v2784_v52  ;;  %v4830_v19 = vmul.f32 %v4810_v63, %v2784_v52  ;;  %v2373_v20 = vrot.slane %v2359_v54, %v4676_v40  ;;  %v1724_v27 = vmax.f32 %v1643_v57, 0.0 }
 0x113   : > { %v1727_v29 = vmax.f32 %v1654_v0, 0.0  ;;  %v1891_v31 = vcombine.high %v1749_v23, %v1749_v23  ;;  %v1898_v33 = vrot.slane %v1749_v23, %v4676_v40  ;;  %v1725_v35 = vmax.f32 %v1646_v6, 0.0 }
 0x114   : > { %v2374_v7 = vcombine.low %v2366_v4, %v2373_v20  ;;  %v2902_v36 = vrot.slane %v2853_v11, 1  ;;  %v3028_v38 = vrot.slane %v2979_v12, 2  ;;  %v1747_v42 = vmin.f32 %v1724_v27, 6.0  ;;  %v4845_v43 = vpop.f32.mrb[8].mxu0 }
 0x115   : > { %v1905_v50 = vrot.slane %v1891_v31, %v4676_v40  ;;  %v1906_v51 = vcombine.high %v1898_v33, %v1898_v33  ;;  %v4851_v52 = vpop.f32.mrb[9].mxu0  ;;  %v1750_v58 = vmin.f32 %v1727_v29, 6.0  ;;  %v4864_v11 = vmin.f32 %v1725_v35, 6.0 }
 0x116   : > { %v2782_v46 = vsel %vm4685_vm6, %v2374_v7, 0.0  ;;  %v1857_v57 = vcombine.high %v1747_v42, %v1747_v42  ;;  %v4859_v0 = vpop.f32.mrb[10].mxu0  ;;  %v1864_v6 = vrot.slane %v1747_v42, %v4676_v40  ;;  %vm2256_vm6 = vmand %vm4733_vm11, %vm2250_vm5  ;;  %vm2189_vm10 = vcmp.ge.s32.totalorder %v4703_v59, 1 }
 0x117   : > { %v2854_v54 = vmul.f32 %v4715_v8, %v2782_v46  ;;  %v2980_v56 = vmul.f32 %v4720_v9, %v2782_v46  ;;  %v2817_v47 = vmul.f32 %v4782_v48, %v2782_v46  ;;  %v2463_v4 = vrot.slane %v1905_v50, %v4676_v40  ;;  %v4866_v12 = vpop.f32.mrb[11].mxu0 }
 0x118   : > { %v4868_v27 = vcombine.low %v1898_v33, %v1906_v51  ;;  %v1871_v7 = vrot.slane %v1857_v57, %v4676_v40  ;;  %v1872_v29 = vcombine.high %v1864_v6, %v1864_v6  ;;  %v2400_v46 = vcombine.low %v1856_v49, %v1864_v6  ;;  %v4887_v51 = vld [vmem:[%s6218_s3 + $0x9] ss:$0 sm:$0xff] }
 0x119   : > { %v2903_v20 = vrot.slane %v2854_v54, 1  ;;  %v3029_v23 = vrot.slane %v2980_v56, 2  ;;  %v4871_v31 = vsel %vm2259_vm4, %v2463_v4, 0.0  ;;  %v1907_v44 = vcombine.high %v1905_v50, %v1905_v50 }
 0x11a   : > { %v4895_v21 = vmul.f32 %v4720_v9, %v4871_v31  ;;  %v4899_v22 = vmul.f32 %v4791_v53, %v4871_v31  ;;  %v4909_v57 = vmul.f32 %v4887_v51, %v4871_v31 }
 0x11b   : > { %v2904_v42 = vsel %vm2901_vm0, %v2902_v36, %v2903_v20  ;;  %v2906_v35 = vsel %vm2901_vm0, %v2903_v20, %v2905_v45  ;;  %v3030_v54 = vsel %vm3027_vm2, %v3028_v38, %v3029_v23  ;;  %v3032_v33 = vsel %vm3027_vm2, %v3029_v23, %v3031_v30 }
 0x11c   : > { %v2958_v16 = vadd.f32 %v2904_v42, %v2816_v10  ;;  %v2959_v49 = vadd.f32 %v2906_v35, %v2817_v47  ;;  %v4891_v36 = vmul.f32 %v4715_v8, %v4871_v31  ;;  %6283 = vst [vmem:[#allocation3_spill] sm:$0xff] %v4895_v21  ;;  %6284 = vst [vmem:[#allocation4_spill] sm:$0xff] %v4899_v22 }
 0x11d   : > { %v4903_v45 = vmul.f32 %v4810_v63, %v4871_v31  ;;  %v1873_v30 = vcombine.high %v1871_v7, %v1871_v7  ;;  %v1908_v38 = vcombine.high %v1750_v58, %v1750_v58  ;;  %v2414_v20 = vrot.slane %v2400_v46, %v4676_v40  ;;  %v4921_v23 = vpop.f32.mrb[12].mxu0 }
 0x11e   : > { %6282 = vst [vmem:[#allocation2_spill] sm:$0xff] %v4891_v36  ;;  %v3084_v10 = vadd.f32 %v3030_v54, %v2958_v16  ;;  %v3085_v50 = vadd.f32 %v3032_v33, %v2959_v49  ;;  %v2422_v54 = vrot.slane %v1872_v29, %v4676_v40  ;;  %v1915_v33 = vrot.slane %v1750_v58, %v4676_v40  ;;  %v4929_v16 = vpop.f32.mrb[13].mxu0 }
 0x11f   : > { %6285 = vst [vmem:[#allocation5_spill] sm:$0xff] %v4903_v45  ;;  %v2415_v46 = vcombine.low %v2407_v1, %v2414_v20  ;;  %v4934_v49 = vcombine.low %v1871_v7, %v1873_v30  ;;  %v4937_v4 = vrot.slane %v1908_v38, %v4676_v40  ;;  %v1881_v58 = vrot.slane %v4864_v11, %v4676_v40 }
 0x120   : > { %v4924_v42 = vadd.f32 %v4827_v17, %v3084_v10  ;;  %v1874_v17 = vcombine.high %v4864_v11, %v4864_v11  ;;  %v4941_v10 = vpop.f32.mrb[14].mxu0  ;;  %v2786_v47 = vsel %vm2256_vm6, %v2422_v54, 0.0  ;;  %v1923_v29 = vcombine.high %v1915_v33, %v1915_v33  ;;  %vm2262_vm6 = vmand %vm4987_vm12, %vm2250_vm5 }
 0x121   : > { %v2464_v35 = vcombine.low %v1907_v44, %v1915_v33  ;;  %v4945_v6 = vpop.f32.mrb[15].mxu0  ;;  %v2785_v41 = vsel %vm4733_vm11, %v2415_v46, 0.0  ;;  %v2858_v1 = vmul.f32 %v4715_v8, %v2786_v47  ;;  %v2984_v7 = vmul.f32 %v4720_v9, %v2786_v47 }
 0x122   : > { %v3145_v30 = vmul.f32 %v4791_v53, %v2786_v47  ;;  %v2819_v38 = vmul.f32 %v4782_v48, %v2785_v41  ;;  %v2857_v20 = vmul.f32 %v4715_v8, %v2785_v41  ;;  %v2983_v44 = vmul.f32 %v4720_v9, %v2785_v41 }
 0x123   : > { %v3107_v54 = vmul.f32 %v4805_v62, %v2785_v41  ;;  %v2910_v11 = vrot.slane %v2858_v1, 1  ;;  %v3036_v33 = vrot.slane %v2984_v7, 2  ;;  %v4957_v39 = vmul.f32 %v4791_v53, %v2785_v41 }
 0x124   : > { %v3194_v18 = vrot.slane %v3145_v30, 1  ;;  %v2908_v46 = vrot.slane %v2857_v20, 1  ;;  %v3034_v56 = vrot.slane %v2983_v44, 2  ;;  %v4960_v25 = vmul.f32 %v4810_v63, %v2785_v41 }
 0x125   : > { %v3123_v26 = vadd.f32 %v3107_v54, %v3085_v50  ;;  %v6228_v21 = vrot.slane %v4957_v39, 1  ;;  %v3270_v36 = vmul.f32 %v4810_v63, %v2786_v47  ;;  %v2465_v45 = vcombine.low %v1923_v29, %v4937_v4 }
 0x126   : > { %v2472_v22 = vrot.slane %v2464_v35, %v4676_v40  ;;  %v6286_v1 = vrot.slane %v4797_v60, 1  ;;  %v2911_v30 = vsel %vm2901_vm0, %v2908_v46, %v2910_v11  ;;  %v6287_v20 = vrot.slane %v4800_v61, 2 }
 0x127   : > { %v3037_v41 = vsel %vm3027_vm2, %v3034_v56, %v3036_v33  ;;  %vm2199_vm11 = vcmp.le.s32.totalorder %v4703_v59, 16  ;;  %v2961_v29 = vadd.f32 %v2911_v30, %v2819_v38  ;;  %v3195_v60 = vsel %vm2901_vm0, %v6228_v21, %v3194_v18 }
 0x128   : > { %v2909_v7 = vsel %vm2901_vm0, %v6286_v1, %v2908_v46  ;;  %v3035_v50 = vsel %vm3027_vm2, %v6287_v20, %v3034_v56  ;;  %v6227_v35 = vrot.slane %v4960_v25, 2  ;;  %v4981_v44 = vadd.f32 %v3195_v60, %v3123_v26  ;;  %vm5055_vm15 = vmand %vm2189_vm10, %vm2199_vm11 }
 0x129   : > { %v2960_v47 = vadd.f32 %v2909_v7, %v4816_v2  ;;  %v3319_v61 = vrot.slane %v3270_v36, 2  ;;  %v2479_v2 = vrot.slane %v2465_v45, %v4676_v40  ;;  %v1888_v38 = vrot.slane %v1874_v17, %v4676_v40  ;;  %v5006_v46 = vpop.f32.mrb[16].mxu0  ;;  %vm5080_vm4 = vmand %vm5055_vm15, %vm2250_vm5 }
 0x12a   : > { %v4995_v11 = vadd.f32 %v3037_v41, %v2961_v29  ;;  %v1889_v33 = vcombine.high %v1881_v58, %v1881_v58  ;;  %v1667_v26 = vadd.f32 %v4845_v43, %v4656_v28  ;;  %v1659_v45 = vadd.f32 %v4656_v28, %v4851_v52  ;;  %vm2230_vm11 = vmand %vm5055_vm15, %vm2215_vm7 }
 0x12b   : > { %v4993_v54 = vadd.f32 %v3035_v50, %v2960_v47  ;;  %v5002_v55 = vsel %vm3027_vm2, %v6227_v35, %v3319_v61  ;;  %v2480_v36 = vcombine.low %v2472_v22, %v2479_v2  ;;  %v1890_v18 = vcombine.high %v1888_v38, %v1888_v38  ;;  %v5016_v22 = vpop.f32.mrb[17].mxu0 }
 0x12c   : > { %6291 = vst [vmem:[#allocation7_spill] sm:$0xff] %v4995_v11  ;;  %v2431_v17 = vrot.slane %v4934_v49, %v4676_v40  ;;  %v2424_v43 = vcombine.low %v1881_v58, %v1889_v33  ;;  %v1730_v1 = vmax.f32 %v1667_v26, 0.0  ;;  %v1670_v7 = vadd.f32 %v4859_v0, %v4656_v28  ;;  %v5021_v49 = vpop.f32.mrb[18].mxu0 }
 0x12d   : > { %6290 = vst [vmem:[#allocation6_spill] sm:$0xff] %v4993_v54  ;;  %v2440_v52 = vcombine.low %v1888_v38, %v1890_v18  ;;  %v1728_v20 = vmax.f32 %v1659_v45, 0.0  ;;  %v1662_v50 = vadd.f32 %v4656_v28, %v4866_v12  ;;  %v1924_v58 = vcombine.high %v4937_v4, %v4937_v4  ;;  %v5026_v60 = vpop.f32.mrb[19].mxu0 }
 0x12e   : > { %v2438_v41 = vrot.slane %v2424_v43, %v4676_v40  ;;  %v1753_v47 = vmin.f32 %v1730_v1, 6.0  ;;  %v1731_v29 = vmax.f32 %v1670_v7, 0.0  ;;  %v5028_v0 = vsel %vm2227_vm13, %v2480_v36, 0.0 }
 0x12f   : > { %6292 = vst [vmem:[#allocation8_spill] sm:$0xff] %v5028_v0  ;;  %v2448_v61 = vrot.slane %v2440_v52, %v4676_v40  ;;  %v1751_v2 = vmin.f32 %v1728_v20, 6.0  ;;  %v1729_v38 = vmax.f32 %v1662_v50, 0.0  ;;  %v6295_v36 = vrot.slane %v4868_v27, %v4676_v40  ;;  %v5044_v52 = vpop.f32.mrb[0].mxu1 }
 0x130   : > { %v2439_v33 = vcombine.low %v2431_v17, %v2438_v41  ;;  %v1959_v26 = vcombine.high %v1753_v47, %v1753_v47  ;;  %v1966_v4 = vrot.slane %v1753_v47, %v4676_v40  ;;  %v1754_v18 = vmin.f32 %v1731_v29, 6.0  ;;  %v5059_v47 = vpop.f32.mrb[1].mxu1 }
 0x131   : > { %v2456_v45 = vcombine.low %v2448_v61, %v6295_v36  ;;  %v1925_v43 = vcombine.high %v1751_v2, %v1751_v2  ;;  %v1932_v1 = vrot.slane %v1751_v2, %v4676_v40  ;;  %v1752_v7 = vmin.f32 %v1729_v38, 6.0 }
 0x132   : > { %v5048_v20 = vmul.f32 %v4715_v8, %v5028_v0  ;;  %v1973_v17 = vrot.slane %v1959_v26, %v4676_v40  ;;  %v1974_v50 = vcombine.high %v1966_v4, %v1966_v4  ;;  %v1976_v41 = vcombine.high %v1754_v18, %v1754_v18  ;;  %v4232_v26 = vpop.f32.mrb[2].mxu1 }
 0x133   : > { %v5063_v29 = vsel %vm5035_vm14, %v2439_v33, 0.0  ;;  %v1939_v61 = vrot.slane %v1925_v43, %v4676_v40  ;;  %v1940_v2 = vcombine.high %v1932_v1, %v1932_v1  ;;  %v5068_v38 = vadd.f32 %v4921_v23, %v4656_v28  ;;  %v5071_v21 = vpop.f32.mrb[3].mxu1 }
 0x134   : > { %6296 = vst [vmem:[#allocation9_spill] sm:$0xff] %v5048_v20  ;;  %v1975_v36 = vcombine.high %v1973_v17, %v1973_v17  ;;  %v2522_v59 = vcombine.low %v1966_v4, %v1974_v50  ;;  %v2481_v30 = vcombine.low %v1924_v58, %v1932_v1  ;;  %v1983_v35 = vrot.slane %v1754_v18, %v4676_v40 }
 0x135   : > { %v1941_v20 = vcombine.high %v1939_v61, %v1939_v61  ;;  %v2482_v0 = vcombine.low %v1940_v2, %v1939_v61  ;;  %v5074_v12 = vrot.slane %v1976_v41, %v4676_v40  ;;  %v1942_v33 = vcombine.high %v1752_v7, %v1752_v7 }
 0x136   : > { %v5086_v58 = vsel %vm4840_vm3, %v2456_v45, 0.0  ;;  %v5090_v4 = vmul.f32 %v4715_v8, %v5063_v29  ;;  %v2523_v18 = vcombine.low %v1973_v17, %v1975_v36  ;;  %v1991_v43 = vcombine.high %v1983_v35, %v1983_v35 }
 0x137   : > { %v2489_v1 = vrot.slane %v2481_v30, %v4676_v40  ;;  %v2496_v50 = vrot.slane %v2482_v0, %v4676_v40  ;;  %v2504_v41 = vrot.slane %v1941_v20, %v4676_v40  ;;  %v2545_v34 = vrot.slane %v1983_v35, %v4676_v40 }
 0x138   : > { %6301 = vst [vmem:[#allocation10_spill] sm:$0xff] %v5090_v4  ;;  %v2530_v45 = vrot.slane %v2522_v59, %v4676_v40  ;;  %v2537_v61 = vrot.slane %v2523_v18, %v4676_v40  ;;  %v5103_v17 = vcombine.low %v1991_v43, %v5074_v12  ;;  %v1949_v2 = vrot.slane %v1752_v7, %v4676_v40  ;;  %v5119_v7 = vld [vmem:[%s6218_s3 + $0xa] ss:$0 sm:$0xff] }
 0x139   : > { %v2497_v26 = vcombine.low %v2489_v1, %v2496_v50  ;;  %v2792_v36 = vsel %vm2262_vm6, %v2504_v41, 0.0  ;;  %v2795_v30 = vsel %vm5080_vm4, %v2545_v34, 0.0  ;;  %v1956_v0 = vrot.slane %v1942_v33, %v4676_v40 }
 0x13a   : > { %v2538_v4 = vcombine.low %v2530_v45, %v2537_v61  ;;  %v2864_v20 = vmul.f32 %v4715_v8, %v2792_v36  ;;  %v5111_v35 = vmul.f32 %v4720_v9, %v2792_v36  ;;  %v5114_v59 = vmul.f32 %v4791_v53, %v2792_v36 }
 0x13b   : > { %v5123_v23 = vsel %vm4987_vm12, %v2497_v26, 0.0  ;;  %v5126_v33 = vmul.f32 %v4810_v63, %v2792_v36  ;;  %v5129_v18 = vmul.f32 %v4887_v51, %v2792_v36  ;;  %v5132_v43 = vmul.f32 %v5119_v7, %v2792_v36 }
 0x13c   : > { %6302 = vst [vmem:[#allocation11_spill] sm:$0xff] %v5111_v35  ;;  %6303 = vst [vmem:[#allocation12_spill] sm:$0xff] %v5114_v59  ;;  %v5136_v1 = vmul.f32 %v4715_v8, %v5123_v23  ;;  %v2920_v50 = vrot.slane %v2864_v20, 1  ;;  %v1957_v41 = vcombine.high %v1949_v2, %v1949_v2  ;;  %v1734_v34 = vmax.f32 %v5068_v38, 0.0 }
 0x13d   : > { %6304 = vst [vmem:[#allocation13_spill] sm:$0xff] %v5123_v23  ;;  %6305 = vst [vmem:[#allocation14_spill] sm:$0xff] %v5126_v33  ;;  %v5146_v36 = vsel %vm5055_vm15, %v2538_v4, 0.0  ;;  %v2867_v23 = vmul.f32 %v4715_v8, %v2795_v30  ;;  %v2993_v20 = vmul.f32 %v4720_v9, %v2795_v30  ;;  %v5160_v45 = vmul.f32 %v4791_v53, %v2795_v30 }
 0x13e   : > { %6306 = vst [vmem:[#allocation15_spill] sm:$0xff] %v5129_v18  ;;  %6307 = vst [vmem:[#allocation16_spill] sm:$0xff] %v5132_v43  ;;  %v6238_v11 = vrot.slane %v5136_v1, 1  ;;  %v5153_v56 = vmul.f32 %v4715_v8, %v5146_v36  ;;  %v5157_v61 = vmul.f32 %v4720_v9, %v5146_v36  ;;  %v5170_v35 = vmul.f32 %v4810_v63, %v2795_v30 }
 0x13f   : > { %6308 = vst [vmem:[#allocation17_spill] sm:$0xff] %v5136_v1  ;;  %6309 = vst [vmem:[#allocation18_spill] sm:$0xff] %v5146_v36  ;;  %v2925_v38 = vrot.slane %v2867_v23, 1  ;;  %v3051_v43 = vrot.slane %v2993_v20, 2  ;;  %v5175_v18 = vmul.f32 %v4887_v51, %v2795_v30  ;;  %vm2191_vm3 = vcmp.ge.s32.totalorder %v4723_v14, 1 }
 0x140   : > { %6310 = vst [vmem:[#allocation19_spill] sm:$0xff] %v5153_v56  ;;  %6311 = vst [vmem:[#allocation20_spill] sm:$0xff] %v5157_v61  ;;  %v5165_v4 = vsel %vm2901_vm0, %v6238_v11, %v2920_v50  ;;  %v6242_v33 = vrot.slane %v5153_v56, 1  ;;  %v6244_v59 = vrot.slane %v5157_v61, 2  ;;  %v2825_v50 = vmul.f32 %v4782_v48, %v5146_v36 }
 0x141   : > { %6312 = vst [vmem:[#allocation21_spill] sm:$0xff] %v5165_v4  ;;  %v1958_v11 = vcombine.high %v1956_v0, %v1956_v0  ;;  %v2505_v26 = vcombine.low %v1949_v2, %v1957_v41  ;;  %v1757_v54 = vmin.f32 %v1734_v34, 6.0  ;;  %vm2200_vm10 = vcmp.le.s32.totalorder %v4710_v3, 16  ;;  %vm5231_vm12 = vmand %vm2191_vm3, %vm2201_vm8 }
 0x142   : > { %v2926_v1 = vsel %vm2901_vm0, %v6242_v33, %v2925_v38  ;;  %v3052_v20 = vsel %vm3027_vm2, %v6244_v59, %v3051_v43  ;;  %v5193_v2 = vmul.f32 %v5119_v7, %v2795_v30  ;;  %v1675_v43 = vadd.f32 %v4656_v28, %v4929_v16  ;;  %vm5245_vm13 = vmand %vm2190_vm9, %vm2200_vm10 }
 0x143   : > { %v2967_v36 = vadd.f32 %v2926_v1, %v2825_v50  ;;  %v2506_v41 = vcombine.low %v1956_v0, %v1958_v11  ;;  %v2513_v38 = vrot.slane %v2505_v26, %v4676_v40  ;;  %v2027_v33 = vcombine.high %v1757_v54, %v1757_v54  ;;  %vm2271_vm14 = vmand %vm5231_vm12, %vm2250_vm5 }
 0x144   : > { %v2034_v61 = vrot.slane %v1757_v54, %v4676_v40  ;;  %v1686_v1 = vadd.f32 %v4941_v10, %v4656_v28  ;;  %v1678_v30 = vadd.f32 %v4656_v28, %v4945_v6  ;;  %v1732_v0 = vmax.f32 %v1675_v43, 0.0  ;;  %vm2233_vm15 = vmand %vm5245_vm13, %vm2215_vm7 }
 0x145   : > { %v5199_v34 = vadd.f32 %v3052_v20, %v2967_v36  ;;  %v2520_v59 = vrot.slane %v2506_v41, %v4676_v40  ;;  %v2041_v54 = vrot.slane %v2027_v33, %v4676_v40  ;;  %v1699_v16 = vadd.f32 %v5006_v46, %v4656_v28  ;;  %vm2268_vm4 = vmand %vm5245_vm13, %vm2250_vm5 }
 0x146   : > { %v2042_v11 = vcombine.high %v2034_v61, %v2034_v61  ;;  %v1735_v36 = vmax.f32 %v1686_v1, 0.0  ;;  %v1733_v50 = vmax.f32 %v1678_v30, 0.0  ;;  %v5215_v10 = vadd.f32 %v4656_v28, %v5016_v22  ;;  %vm2236_vm10 = vmand %vm5231_vm12, %vm2215_vm7 }
 0x147   : > { %6313 = vst [vmem:[#allocation22_spill] sm:$0xff] %v5199_v34  ;;  %v2521_v26 = vcombine.low %v2513_v38, %v2520_v59  ;;  %v2043_v20 = vcombine.high %v2041_v54, %v2041_v54  ;;  %v1755_v41 = vmin.f32 %v1732_v0, 6.0  ;;  %v1738_v27 = vmax.f32 %v1699_v16, 0.0 }
 0x148   : > { %v1992_v33 = vcombine.high %v5074_v12, %v5074_v12  ;;  %v1758_v43 = vmin.f32 %v1735_v36, 6.0  ;;  %v1756_v23 = vmin.f32 %v1733_v50, 6.0  ;;  %v5222_v46 = vcombine.low %v2034_v61, %v2042_v11 }
 0x149   : > { %v5218_v4 = vsel %vm2230_vm11, %v2521_v26, 0.0  ;;  %v2604_v59 = vcombine.low %v2041_v54, %v2043_v20  ;;  %v1993_v38 = vcombine.high %v1755_v41, %v1755_v41  ;;  %v2000_v22 = vrot.slane %v1755_v41, %v4676_v40 }
 0x14a   : > { %v2044_v30 = vcombine.high %v1758_v43, %v1758_v43  ;;  %v2051_v6 = vrot.slane %v1758_v43, %v4676_v40  ;;  %v2010_v12 = vcombine.high %v1756_v23, %v1756_v23  ;;  %v5237_v61 = vmul.f32 %v4715_v8, %v5218_v4 }
 0x14b   : > { %v2007_v54 = vrot.slane %v1993_v38, %v4676_v40  ;;  %v2017_v11 = vrot.slane %v1756_v23, %v4676_v40  ;;  %v1761_v16 = vmin.f32 %v1738_v27, 6.0  ;;  %v2008_v26 = vcombine.high %v2000_v22, %v2000_v22 }
 0x14c   : > { %6316 = vst [vmem:[#allocation23_spill] sm:$0xff] %v5237_v61  ;;  %v2547_v36 = vcombine.low %v1992_v33, %v2000_v22  ;;  %v5250_v50 = vrot.slane %v2044_v30, %v4676_v40  ;;  %v2059_v20 = vcombine.high %v2051_v6, %v2051_v6  ;;  %v2612_v41 = vrot.slane %v2604_v59, %v4676_v40 }
 0x14d   : > { %v2009_v23 = vcombine.high %v2007_v54, %v2007_v54  ;;  %v2024_v27 = vrot.slane %v2010_v12, %v4676_v40  ;;  %v2025_v3 = vcombine.high %v2017_v11, %v2017_v11  ;;  %v2563_v38 = vcombine.low %v2008_v26, %v2007_v54 }
 0x14e   : > { %v2561_v43 = vrot.slane %v2547_v36, %v4676_v40  ;;  %v2605_v1 = vcombine.low %v2051_v6, %v2059_v20  ;;  %v2627_v33 = vrot.slane %v5250_v50, %v4676_v40  ;;  %v2602_v22 = vrot.slane %v5222_v46, %v4676_v40 }
 0x14f   : > { %v2026_v59 = vcombine.high %v2024_v27, %v2024_v27  ;;  %v2564_v30 = vcombine.low %v2009_v23, %v2017_v11  ;;  %v2095_v34 = vcombine.high %v1761_v16, %v1761_v16  ;;  %v6319_v12 = vrot.slane %v5103_v17, %v4676_v40 }
 0x150   : > { %v2619_v6 = vrot.slane %v2605_v1, %v4676_v40  ;;  %v5271_v54 = vsel %vm2271_vm14, %v2627_v33, 0.0  ;;  %v2586_v26 = vrot.slane %v2025_v3, %v4676_v40  ;;  %v2571_v1 = vrot.slane %v2563_v38, %v4676_v40 }
 0x151   : > { %v2562_v36 = vcombine.low %v6319_v12, %v2561_v43  ;;  %6320 = vst [vmem:[#allocation24_spill] sm:$0xff] %v5271_v54  ;;  %v2873_v46 = vmul.f32 %v4715_v8, %v5271_v54  ;;  %v2999_v20 = vmul.f32 %v4720_v9, %v5271_v54  ;;  %v5280_v11 = vmul.f32 %v4791_v53, %v5271_v54 }
 0x152   : > { %v5284_v17 = vmul.f32 %v4810_v63, %v5271_v54  ;;  %v2620_v43 = vcombine.low %v2612_v41, %v2619_v6  ;;  %v2578_v3 = vrot.slane %v2564_v30, %v4676_v40  ;;  %v5296_v56 = vmul.f32 %v4887_v51, %v5271_v54 }
 0x153   : > { %6321 = vst [vmem:[#allocation25_spill] sm:$0xff] %v5280_v11  ;;  %v5287_v23 = vsel %vm2233_vm15, %v2562_v36, 0.0  ;;  %v2935_v12 = vrot.slane %v2873_v46, 1  ;;  %v2102_v38 = vrot.slane %v1761_v16, %v4676_v40  ;;  %vm2193_vm6 = vcmp.ge.s32.totalorder %v4764_v37, 1 }
 0x154   : > { %6322 = vst [vmem:[#allocation26_spill] sm:$0xff] %v5284_v17  ;;  %6323 = vst [vmem:[#allocation27_spill] sm:$0xff] %v5287_v23  ;;  %v5292_v33 = vmul.f32 %v4715_v8, %v5287_v23  ;;  %vm2203_vm3 = vcmp.le.s32.totalorder %v4764_v37, 16  ;;  %v5307_v41 = vsel %vm5231_vm12, %v2620_v43, 0.0  ;;  %v3061_v30 = vrot.slane %v2999_v20, 2 }
 0x155   : > { %6325 = vst [vmem:[#allocation29_spill] sm:$0xff] %v5296_v56  ;;  %v2579_v6 = vcombine.low %v2571_v1, %v2578_v3  ;;  %v5312_v46 = vmul.f32 %v4715_v8, %v5307_v41  ;;  %v2587_v54 = vcombine.low %v2024_v27, %v2026_v59  ;;  %v2829_v61 = vmul.f32 %v4782_v48, %v5307_v41  ;;  %vm5400_vm12 = vmand %vm2193_vm6, %vm2203_vm3 }
 0x156   : > { %6324 = vst [vmem:[#allocation28_spill] sm:$0xff] %v5292_v33  ;;  %v5316_v33 = vmul.f32 %v4720_v9, %v5307_v41  ;;  %v5325_v43 = vsel %vm2268_vm4, %v2586_v26, 0.0  ;;  %v2109_v1 = vrot.slane %v2095_v34, %v4676_v40  ;;  %v2110_v23 = vcombine.high %v2102_v38, %v2102_v38  ;;  %vm2242_vm14 = vmand %vm5400_vm12, %vm2215_vm7 }
 0x157   : > { %6326 = vst [vmem:[#allocation30_spill] sm:$0xff] %v5312_v46  ;;  %v5323_v20 = vsel %vm5245_vm13, %v2579_v6, 0.0  ;;  %v6251_v3 = vrot.slane %v5312_v46, 1  ;;  %v2595_v11 = vrot.slane %v2587_v54, %v4676_v40  ;;  %v2870_v14 = vmul.f32 %v4715_v8, %v5325_v43 }
 0x158   : > { %6327 = vst [vmem:[#allocation31_spill] sm:$0xff] %v5316_v33  ;;  %v6250_v36 = vrot.slane %v5316_v33, 2  ;;  %v5333_v27 = vmul.f32 %v4715_v8, %v5323_v20  ;;  %v5339_v59 = vmul.f32 %v4720_v9, %v5323_v20  ;;  %v2996_v34 = vmul.f32 %v4720_v9, %v5325_v43 }
 0x159   : > { %vm2192_vm8 = vcmp.ge.s32.totalorder %v4726_v15, 1  ;;  %vm2202_vm9 = vcmp.le.s32.totalorder %v4726_v15, 16  ;;  %v2936_v54 = vsel %vm2901_vm0, %v6251_v3, %v2935_v12  ;;  %v2603_v8 = vcombine.low %v2595_v11, %v2602_v22 }
 0x15a   : > { %6328 = vst [vmem:[#allocation32_spill] sm:$0xff] %v5333_v27  ;;  %6329 = vst [vmem:[#allocation33_spill] sm:$0xff] %v5339_v59  ;;  %v5351_v26 = vsel %vm3027_vm2, %v6250_v36, %v3061_v30  ;;  %v5359_v9 = vmul.f32 %v4791_v53, %v5325_v43  ;;  %vm2194_vm11 = vcmp.ge.s32.totalorder %v4747_v24, 1  ;;  %vm2204_vm13 = vcmp.le.s32.totalorder %v4747_v24, 16 }
 0x15b   : > { %6330 = vst [vmem:[#allocation34_spill] sm:$0xff] %v5351_v26  ;;  %v5363_v12 = vadd.f32 %v2936_v54, %v2829_v61  ;;  %v6255_v6 = vrot.slane %v5333_v27, 1  ;;  %v2930_v30 = vrot.slane %v2870_v14, 1  ;;  %v6254_v36 = vrot.slane %v5339_v59, 2  ;;  %vm5427_vm15 = vmand %vm2192_vm8, %vm2202_vm9 }
 0x15c   : > { %6331 = vst [vmem:[#allocation35_spill] sm:$0xff] %v5359_v9  ;;  %v2827_v0 = vmul.f32 %v4782_v48, %v5323_v20  ;;  %v3056_v22 = vrot.slane %v2996_v34, 2  ;;  %v5372_v11 = vmul.f32 %v4810_v63, %v5325_v43  ;;  %v5374_v16 = vsel %vm2236_vm10, %v2603_v8, 0.0  ;;  %vm5439_vm4 = vmand %vm2194_vm11, %vm2204_vm13 }
 0x15d   : > { %6332 = vst [vmem:[#allocation36_spill] sm:$0xff] %v5363_v12  ;;  %v2931_v61 = vsel %vm2901_vm0, %v6255_v6, %v2930_v30  ;;  %v2111_v54 = vcombine.high %v2109_v1, %v2109_v1  ;;  %v2669_v14 = vcombine.low %v2102_v38, %v2110_v23  ;;  %v6336_v46 = vmax.f32 %v5215_v10, 0.0  ;;  %vm5457_vm6 = vmand %vm5427_vm15, %vm2215_vm7 }
 0x15e   : > { %6333 = vst [vmem:[#allocation37_spill] sm:$0xff] %v5372_v11  ;;  %v5379_v33 = vadd.f32 %v2931_v61, %v2827_v0  ;;  %v5384_v3 = vsel %vm3027_vm2, %v6254_v36, %v3056_v22  ;;  %v5392_v12 = vmul.f32 %v4887_v51, %v5325_v43  ;;  %v2060_v23 = vcombine.high %v5250_v50, %v5250_v50  ;;  %vm5469_vm3 = vmand %vm5439_vm4, %vm2250_vm5 }
 0x15f   : > { %6335 = vst [vmem:[#allocation39_spill] sm:$0xff] %v5384_v3  ;;  %v1759_v26 = vmin.f32 %v6336_v46, 6.0  ;;  %v2670_v30 = vcombine.low %v2109_v1, %v2111_v54  ;;  %v1715_v0 = vadd.f32 %v5044_v52, %v4656_v28  ;;  %v1702_v1 = vadd.f32 %v5021_v49, %v4656_v28  ;;  %vm2277_vm8 = vmand %vm5400_vm12, %vm2250_vm5 }
 0x160   : > { %6334 = vst [vmem:[#allocation38_spill] sm:$0xff] %v5379_v33  ;;  %v2677_v22 = vrot.slane %v2669_v14, %v4676_v40  ;;  %v1707_v37 = vadd.f32 %v4656_v28, %v5059_v47  ;;  %v1694_v61 = vadd.f32 %v4656_v28, %v5026_v60  ;;  %vm2274_vm9 = vmand %vm5427_vm15, %vm2250_vm5 }
 0x161   : > { %v2061_v10 = vcombine.high %v1759_v26, %v1759_v26  ;;  %v2068_v46 = vrot.slane %v1759_v26, %v4676_v40  ;;  %v2684_v50 = vrot.slane %v2670_v30, %v4676_v40  ;;  %v1742_v6 = vmax.f32 %v1715_v0, 0.0  ;;  %vm2245_vm5 = vmand %vm5439_vm4, %vm2215_vm7 }
 0x162   : > { %v1739_v52 = vmax.f32 %v1702_v1, 0.0  ;;  %v1740_v14 = vmax.f32 %v1707_v37, 0.0  ;;  %v1737_v30 = vmax.f32 %v1694_v61, 0.0  ;;  %vm3758_vm7 = vcmask 195584  }
 0x163   : > { %v5416_v54 = vrot.slane %v2061_v10, %v4676_v40  ;;  %v2076_v26 = vcombine.high %v2068_v46, %v2068_v46  ;;  %v2628_v36 = vcombine.low %v2060_v23, %v2068_v46  ;;  %v2685_v49 = vcombine.low %v2677_v22, %v2684_v50 }
 0x164   : > { %v1765_v10 = vmin.f32 %v1742_v6, 6.0  ;;  %v1710_v46 = vadd.f32 %v4656_v28, %v5071_v21  ;;  %v1762_v15 = vmin.f32 %v1739_v52, 6.0  ;;  %v1763_v22 = vmin.f32 %v1740_v14, 6.0 }
 0x165   : > { %v2629_v23 = vcombine.low %v2076_v26, %v5416_v54  ;;  %v2636_v0 = vrot.slane %v2628_v36, %v4676_v40  ;;  %v5443_v50 = vsel %vm2242_vm14, %v2685_v49, 0.0  ;;  %v1760_v21 = vmin.f32 %v1737_v30, 6.0 }
 0x166   : > { %6343 = vst [vmem:[#allocation40_spill] sm:$0xff] %v5443_v50  ;;  %v5447_v6 = vrot.slane %v1765_v10, %v4676_v40  ;;  %v5451_v28 = vmul.f32 %v4791_v53, %v5443_v50  ;;  %v2112_v36 = vcombine.high %v1762_v15, %v1762_v15  ;;  %v2119_v61 = vrot.slane %v1762_v15, %v4676_v40 }
 0x167   : > { %v2643_v37 = vrot.slane %v2629_v23, %v4676_v40  ;;  %v2129_v26 = vcombine.high %v1763_v22, %v1763_v22  ;;  %v2136_v49 = vrot.slane %v1763_v22, %v4676_v40  ;;  %v5475_v23 = vmul.f32 %v4805_v62, %v5443_v50 }
 0x168   : > { %v2170_v14 = vcombine.high %v5447_v6, %v5447_v6  ;;  %v2077_v10 = vcombine.high %v5416_v54, %v5416_v54  ;;  %v2127_v15 = vcombine.high %v2119_v61, %v2119_v61  ;;  %v2078_v17 = vcombine.high %v1760_v21, %v1760_v21 }
 0x169   : > { %v2644_v52 = vcombine.low %v2636_v0, %v2643_v37  ;;  %v2126_v0 = vrot.slane %v2112_v36, %v4676_v40  ;;  %v5481_v22 = vrot.slane %v2129_v26, %v4676_v40  ;;  %v2144_v37 = vcombine.high %v2136_v49, %v2136_v49 }
 0x16a   : > { %v2750_v8 = vrot.slane %v2170_v14, %v4676_v40  ;;  %v2709_v34 = vrot.slane %v2136_v49, %v4676_v40  ;;  %v2686_v59 = vcombine.low %v2119_v61, %v2127_v15  ;;  %v5495_v26 = vmul.f32 %v4810_v63, %v5443_v50 }
 0x16b   : > { %v2128_v54 = vcombine.high %v2126_v0, %v2126_v0  ;;  %v5491_v36 = vcombine.low %v2144_v37, %v5481_v22  ;;  %v5499_v27 = vsel %vm5457_vm6, %v2644_v52, 0.0  ;;  %v2085_v47 = vrot.slane %v1760_v21, %v4676_v40 }
 0x16c   : > { %v2810_v14 = vsel %vm5469_vm3, %v2750_v8, 0.0  ;;  %v2807_v49 = vsel %vm2277_vm8, %v2709_v34, 0.0  ;;  %v2092_v37 = vrot.slane %v2078_v17, %v4676_v40  ;;  %v1741_v8 = vmax.f32 %v1710_v46, 0.0 }
 0x16d   : > { %v5505_v3 = vmul.f32 %v4887_v51, %v2810_v14  ;;  %v5508_v61 = vmul.f32 %v5119_v7, %v2810_v14  ;;  %v2687_v15 = vcombine.low %v2126_v0, %v2128_v54  ;;  %v3166_v50 = vmul.f32 %v4791_v53, %v2807_v49 }
 0x16e   : > { %v3291_v24 = vmul.f32 %v4810_v63, %v2807_v49  ;;  %v5514_v52 = vmul.f32 %v4887_v51, %v2807_v49  ;;  %v2694_v34 = vrot.slane %v2686_v59, %v4676_v40  ;;  %v5521_v14 = vmul.f32 %v5119_v7, %v2807_v49 }
 0x16f   : > { %6348 = vst [vmem:[#allocation41_spill] sm:$0xff] %v5505_v3  ;;  %6349 = vst [vmem:[#allocation42_spill] sm:$0xff] %v5508_v61  ;;  %v2701_v21 = vrot.slane %v2687_v15, %v4676_v40  ;;  %v3229_v54 = vrot.slane %v3166_v50, 1  ;;  %v2093_v33 = vcombine.high %v2085_v47, %v2085_v47  ;;  %v2094_v9 = vcombine.high %v2092_v37, %v2092_v37  ;;  %v6374_v3 = vld [vmem:[#allocation15_spill] sm:$0xff] }
 0x170   : > { %6350 = vst [vmem:[#allocation43_spill] sm:$0xff] %v5521_v14  ;;  %v3354_v11 = vrot.slane %v3291_v24, 2  ;;  %v2645_v46 = vcombine.low %v2077_v10, %v2085_v47  ;;  %v1764_v30 = vmin.f32 %v1741_v8, 6.0  ;;  %v5540_v47 = vld [vmem:[%s6218_s3 + $0x1] ss:$0 sm:$0xff]  ;;  %v2145_v10 = vcombine.high %v5481_v22, %v5481_v22 }
 0x171   : > { %v2702_v56 = vcombine.low %v2694_v34, %v2701_v21  ;;  %v2646_v49 = vcombine.low %v2093_v33, %v2092_v37  ;;  %v2668_v24 = vrot.slane %v2094_v9, %v4676_v40  ;;  %v2874_v32 = vmul.f32 %v5540_v47, %v5499_v27  ;;  %v5565_v22 = vld [vmem:[%s6218_s3 + $0x2] ss:$0 sm:$0xff] }
 0x172   : > { %v2653_v50 = vrot.slane %v2645_v46, %v4676_v40  ;;  %v2146_v37 = vcombine.high %v1764_v30, %v1764_v30  ;;  %v2153_v8 = vrot.slane %v1764_v30, %v4676_v40  ;;  %v2830_v34 = vmul.f32 %v4782_v48, %v5499_v27 }
 0x173   : > { %v5533_v0 = vsel %vm5400_vm12, %v2702_v56, 0.0  ;;  %v2660_v56 = vrot.slane %v2646_v49, %v4676_v40  ;;  %v5551_v9 = vsel %vm2274_vm9, %v2668_v24, 0.0  ;;  %v2937_v24 = vrot.slane %v2874_v32, 1 }
 0x174   : > { %v3165_v33 = vmul.f32 %v4791_v53, %v5533_v0  ;;  %v3290_v38 = vmul.f32 %v4810_v63, %v5533_v0  ;;  %v2876_v17 = vmul.f32 %v5540_v47, %v5551_v9  ;;  %v5560_v49 = vmul.f32 %v4805_v62, %v5533_v0 }
 0x175   : > { %v2661_v15 = vcombine.low %v2653_v50, %v2660_v56  ;;  %v5569_v30 = vmul.f32 %v5565_v22, %v5551_v9  ;;  %v2160_v48 = vrot.slane %v2146_v37, %v4676_v40  ;;  %v3000_v60 = vmul.f32 %v5565_v22, %v5499_v27 }
 0x176   : > { %v3227_v21 = vrot.slane %v3165_v33, 1  ;;  %v3352_v46 = vrot.slane %v3290_v38, 2  ;;  %6351 = vst [vmem:[#allocation44_spill] sm:$0xff] %v5560_v49  ;;  %v5584_v38 = vmul.f32 %v4791_v53, %v5551_v9  ;;  %v2940_v59 = vrot.slane %v2876_v17, 1 }
 0x177   : > { %v5580_v62 = vsel %vm5427_vm15, %v2661_v15, 0.0  ;;  %v2162_v37 = vcombine.high %v2160_v48, %v2160_v48  ;;  %v3351_v32 = vrot.slane %v5495_v26, 2 }
 0x178   : > { %v5573_v50 = vsel %vm2901_vm0, %v3227_v21, %v3229_v54  ;;  %v5576_v33 = vsel %vm3027_vm2, %v3352_v46, %v3354_v11  ;;  %v2875_v56 = vmul.f32 %v5540_v47, %v5580_v62  ;;  %v5591_v54 = vmul.f32 %v4810_v63, %v5551_v9 }
 0x179   : > { %6352 = vst [vmem:[#allocation45_spill] sm:$0xff] %v5573_v50  ;;  %6353 = vst [vmem:[#allocation46_spill] sm:$0xff] %v5576_v33  ;;  %v2161_v11 = vcombine.high %v2153_v8, %v2153_v8  ;;  %v2711_v33 = vcombine.low %v2145_v10, %v2153_v8  ;;  %v5597_v53 = vmul.f32 %v5565_v22, %v5580_v62  ;;  %v6354_v50 = vrot.slane %v5451_v28, 1 }
 0x17a   : > { %v2938_v15 = vrot.slane %v2875_v56, 1  ;;  %v2728_v61 = vcombine.low %v2162_v37, %v5447_v6  ;;  %v3063_v10 = vrot.slane %v3000_v60, 2  ;;  %v3353_v26 = vsel %vm3027_vm2, %v3351_v32, %v3352_v46 }
 0x17b   : > { %v3228_v17 = vsel %vm2901_vm0, %v6354_v50, %v3227_v21  ;;  %v2725_v63 = vrot.slane %v2711_v33, %v4676_v40  ;;  %v2727_v49 = vcombine.low %v2161_v11, %v2160_v48  ;;  %v6265_v21 = vrot.slane %v5597_v53, 2 }
 0x17c   : > { %v5606_v8 = vsel %vm2901_vm0, %v2938_v15, %v2940_v59  ;;  %v2939_v28 = vsel %vm2901_vm0, %v2937_v24, %v2938_v15  ;;  %v6356_v48 = vrot.slane %v5491_v36, %v4676_v40  ;;  %v2742_v59 = vrot.slane %v2728_v61, %v4676_v40 }
 0x17d   : > { %6355 = vst [vmem:[#allocation47_spill] sm:$0xff] %v5606_v8  ;;  %v2735_v6 = vrot.slane %v2727_v49, %v4676_v40  ;;  %v2972_v33 = vadd.f32 %v2939_v28, %v2830_v34  ;;  %v3065_v24 = vsel %vm3027_vm2, %v3063_v10, %v6265_v21  ;;  %v6357_v46 = vrot.slane %v4957_v39, 1  ;;  %v6372_v39 = vld [vmem:[#allocation5_spill] sm:$0xff] }
 0x17e   : > { %v2726_v50 = vcombine.low %v6356_v48, %v2725_v63  ;;  %v6358_v56 = vrot.slane %v4824_v13, 1  ;;  %v6359_v49 = vrot.slane %v4960_v25, 2  ;;  %v6360_v40 = vrot.slane %v4830_v19, 2 }
 0x17f   : > { %v3373_v34 = vadd.f32 %v5002_v55, %v4981_v44  ;;  %v2743_v32 = vcombine.low %v2735_v6, %v2742_v59  ;;  %v3098_v37 = vadd.f32 %v3065_v24, %v2972_v33  ;;  %v3394_v19 = vmul.f32 %v5623_v5, %v5063_v29 }
 0x180   : > { %v3193_v36 = vsel %vm2901_vm0, %v6358_v56, %v6357_v46  ;;  %v3318_v61 = vsel %vm3027_vm2, %v6360_v40, %v6359_v49  ;;  %v2808_v11 = vsel %vm2245_vm5, %v2726_v50, 0.0  ;;  %v3431_v24 = vmul.f32 %v4887_v51, %v5063_v29 }
 0x181   : > { %v3247_v60 = vadd.f32 %v3193_v36, %v4924_v42  ;;  %v5643_v13 = vmul.f32 %v4887_v51, %v2808_v11  ;;  %v5646_v15 = vmul.f32 %v5119_v7, %v2808_v11  ;;  %v5652_v25 = vsel %vm5439_vm4, %v2743_v32, 0.0  ;;  %v5684_v32 = vld [vmem:[%s6218_s3 + $0x4] ss:$0 sm:$0xff] }
 0x182   : > { %6362 = vst [vmem:[#allocation49_spill] sm:$0xff] %v5652_v25  ;;  %v3136_v44 = vadd.f32 %v5475_v23, %v3098_v37  ;;  %v3395_v42 = vmul.f32 %v5623_v5, %v5086_v58  ;;  %v3408_v10 = vmul.f32 %v5623_v5, %v2808_v11  ;;  %v5661_v28 = vmul.f32 %v4887_v51, %v5652_v25 }
 0x183   : > { %6361 = vst [vmem:[#allocation48_spill] sm:$0xff] %v5646_v15  ;;  %v3372_v55 = vadd.f32 %v3318_v61, %v3247_v60  ;;  %v5665_v48 = vmul.f32 %v5119_v7, %v5652_v25  ;;  %v3432_v46 = vmul.f32 %v4887_v51, %v5086_v58  ;;  %v3556_v36 = vmul.f32 %v5119_v7, %v5063_v29 }
 0x184   : > { %v3261_v1 = vadd.f32 %v3228_v17, %v3136_v44  ;;  %v3411_v6 = vadd.f32 %v3395_v42, %v3373_v34  ;;  %v3557_v17 = vmul.f32 %v5119_v7, %v5086_v58  ;;  %v3558_v49 = vmul.f32 %v5119_v7, %v4871_v31  ;;  %v6366_v42 = vld [vmem:[#allocation6_spill] sm:$0xff] }
 0x185   : > { %6363 = vst [vmem:[#allocation50_spill] sm:$0xff] %v5665_v48  ;;  %v3410_v23 = vadd.f32 %v3394_v19, %v3372_v55  ;;  %v3479_v61 = vrot.slane %v3431_v24, 1  ;;  %v3480_v34 = vrot.slane %v3432_v46, 1  ;;  %v3108_v51 = vmul.f32 %v5684_v32, %v5063_v29 }
 0x186   : > { %v3386_v56 = vadd.f32 %v3353_v26, %v3261_v1  ;;  %v3604_v11 = vrot.slane %v3556_v36, 2  ;;  %v3605_v37 = vrot.slane %v3557_v17, 2  ;;  %v3607_v60 = vrot.slane %v3558_v49, 2  ;;  %v5708_v17 = vld [vmem:[%s6218_s3 + $0x5] ss:$0 sm:$0xff] }
 0x187   : > { %v3481_v19 = vsel %vm2901_vm0, %v3479_v61, %v3480_v34  ;;  %v6365_v31 = vrot.slane %v4909_v57, 1  ;;  %v3109_v55 = vmul.f32 %v5684_v32, %v5086_v58  ;;  %v3124_v1 = vadd.f32 %v3108_v51, %v6366_v42  ;;  %v6367_v57 = vld [vmem:[#allocation7_spill] sm:$0xff]  ;;  %v5717_v49 = vld [vmem:[%s6218_s3 + $0x6] ss:$0 sm:$0xff] }
 0x188   : > { %v5688_v26 = vadd.f32 %v3408_v10, %v3386_v56  ;;  %v3535_v24 = vadd.f32 %v3481_v19, %v3410_v23  ;;  %v3606_v33 = vsel %vm3027_vm2, %v3604_v11, %v3605_v37  ;;  %v3608_v10 = vsel %vm3027_vm2, %v3605_v37, %v3607_v60  ;;  %v5702_v56 = vld [vmem:[%s6219_s4] ss:$0 sm:$0xff]  ;;  %v6368_v37 = vld [vmem:[#allocation8_spill] sm:$0xff] }
 0x189   : > { %v3483_v44 = vsel %vm2901_vm0, %v3480_v34, %v6365_v31  ;;  %v3125_v36 = vadd.f32 %v3109_v55, %v6367_v57  ;;  %v3146_v23 = vmul.f32 %v5708_v17, %v5063_v29  ;;  %v3271_v61 = vmul.f32 %v5717_v49, %v5063_v29  ;;  %v6369_v55 = vld [vmem:[#allocation13_spill] sm:$0xff] }
 0x18a   : > { %6364 = vst [vmem:[#allocation51_spill] sm:$0xff] %v5688_v26  ;;  %v3536_v46 = vadd.f32 %v3483_v44, %v3411_v6  ;;  %v3147_v6 = vmul.f32 %v5708_v17, %v5086_v58  ;;  %v3660_v34 = vadd.f32 %v3606_v33, %v3535_v24  ;;  %v3272_v11 = vmul.f32 %v5717_v49, %v5086_v58  ;;  %v5732_v33 = vld [vmem:[%s6218_s3 + $0x9] ss:$0 sm:$0xff] }
 0x18b   : > { %v3396_v60 = vmul.f32 %v5623_v5, %v6368_v37  ;;  %v3196_v19 = vrot.slane %v3146_v23, 1  ;;  %v3321_v44 = vrot.slane %v3271_v61, 2  ;;  %v3397_v42 = vmul.f32 %v5623_v5, %v6369_v55 }
 0x18c   : > { %v3661_v51 = vadd.f32 %v3608_v10, %v3536_v46  ;;  %v3197_v31 = vrot.slane %v3147_v6, 1  ;;  %v3683_v57 = vadd.f32 %v5702_v56, %v3660_v34  ;;  %v3322_v50 = vrot.slane %v3272_v11, 2  ;;  %v6370_v10 = vld [vmem:[#allocation4_spill] sm:$0xff] }
 0x18d   : > { %v3434_v24 = vmul.f32 %v5732_v33, %v6368_v37  ;;  %v6371_v23 = vrot.slane %v6370_v10, 1  ;;  %v3435_v61 = vmul.f32 %v5732_v33, %v6369_v55  ;;  %v3559_v34 = vmul.f32 %v5119_v7, %v6368_v37 }
 0x18e   : > { %v3684_v40 = vadd.f32 %v5702_v56, %v3661_v51  ;;  %v3198_v46 = vsel %vm2901_vm0, %v3196_v19, %v3197_v31  ;;  %v3699_v51 = vmax.f32 %v3683_v57, 0.0  ;;  %v3323_v63 = vsel %vm3027_vm2, %v3321_v44, %v3322_v50 }
 0x18f   : > { %v3200_v6 = vsel %vm2901_vm0, %v3197_v31, %v6371_v23  ;;  %v3249_v59 = vadd.f32 %v3198_v46, %v3124_v1  ;;  %v6373_v25 = vrot.slane %v6372_v39, 2  ;;  %v3484_v15 = vrot.slane %v3434_v24, 1  ;;  %v6377_v24 = vld [vmem:[#allocation16_spill] sm:$0xff] }
 0x190   : > { %v3700_v11 = vmax.f32 %v3684_v40, 0.0  ;;  %v3250_v21 = vadd.f32 %v3200_v6, %v3125_v36  ;;  %v3485_v10 = vrot.slane %v3435_v61, 1  ;;  %v3715_v48 = vmin.f32 %v3699_v51, 6.0 }
 0x191   : > { %v3325_v19 = vsel %vm3027_vm2, %v3322_v50, %v6373_v25  ;;  %v3374_v23 = vadd.f32 %v3323_v63, %v3249_v59  ;;  %v6375_v8 = vrot.slane %v6374_v3, 1  ;;  %v3560_v1 = vmul.f32 %v5119_v7, %v6369_v55  ;;  %v5757_v25 = vld [vmem:[%s6218_s3] ss:$0 sm:$0xff] }
 0x192   : > { %v3716_v31 = vmin.f32 %v3700_v11, 6.0  ;;  %v3375_v14 = vadd.f32 %v3325_v19, %v3250_v21  ;;  %v3486_v26 = vsel %vm2901_vm0, %v3484_v15, %v3485_v10  ;;  %v3609_v36 = vrot.slane %v3559_v34, 2  ;;  %v6376_v63 = vld [vmem:[#allocation10_spill] sm:$0xff] }
 0x193   : > { %v3488_v40 = vsel %vm2901_vm0, %v3485_v10, %v6375_v8  ;;  %v3412_v39 = vadd.f32 %v3396_v60, %v3374_v23  ;;  %v2820_v21 = vmul.f32 %v5757_v25, %v5063_v29  ;;  %v3610_v15 = vrot.slane %v3560_v1, 2 }
 0x194   : > { %v3731_v44 = vpack.c.bf16 %v3716_v31, %v3715_v48  ;;  %v3413_v57 = vadd.f32 %v3397_v42, %v3375_v14  ;;  %v2821_v3 = vmul.f32 %v5757_v25, %v5086_v58  ;;  %v2860_v8 = vmul.f32 %v5540_v47, %v5086_v58 }
 0x195   : > { %v2912_v50 = vrot.slane %v6376_v63, 1  ;;  %v3537_v14 = vadd.f32 %v3486_v26, %v3412_v39  ;;  %v2985_v59 = vmul.f32 %v5565_v22, %v5063_v29  ;;  %v2986_v60 = vmul.f32 %v5565_v22, %v5086_v58  ;;  %v6379_v29 = vld [vmem:[#allocation2_spill] sm:$0xff] }
 0x196   : > { %4237 = vmatprep.mubr.msk.bf16.mxu1 %vm3758_vm7, %v3731_v44  ;;  %v3538_v48 = vadd.f32 %v3488_v40, %v3413_v57  ;;  %v3611_v42 = vsel %vm3027_vm2, %v3609_v36, %v3610_v15  ;;  %v6378_v46 = vrot.slane %v6377_v24, 2  ;;  %v2913_v61 = vrot.slane %v2860_v8, 1 }
 0x197   : > { %v3110_v34 = vmul.f32 %v5684_v32, %v6368_v37  ;;  %v3662_v51 = vadd.f32 %v3611_v42, %v3537_v14  ;;  %v3038_v26 = vrot.slane %v2985_v59, 2  ;;  %v3039_v19 = vrot.slane %v2986_v60, 2 }
 0x198   : > { %v3613_v6 = vsel %vm3027_vm2, %v3610_v15, %v6378_v46  ;;  %v2914_v10 = vsel %vm2901_vm0, %v2912_v50, %v2913_v61  ;;  %v6380_v31 = vrot.slane %v6379_v29, 1  ;;  %v3111_v23 = vmul.f32 %v5684_v32, %v6369_v55  ;;  %v6381_v15 = vld [vmem:[#allocation3_spill] sm:$0xff] }
 0x199   : > { %v3663_v11 = vadd.f32 %v3613_v6, %v3538_v48  ;;  %v3149_v40 = vmul.f32 %v5708_v17, %v6368_v37  ;;  %v3685_v1 = vadd.f32 %v5702_v56, %v3662_v51  ;;  %v2962_v44 = vadd.f32 %v2914_v10, %v2820_v21 }
 0x19a   : > { %v2916_v58 = vsel %vm2901_vm0, %v2913_v61, %v6380_v31  ;;  %v3040_v57 = vsel %vm3027_vm2, %v3038_v26, %v3039_v19  ;;  %v6382_v8 = vrot.slane %v6381_v15, 2  ;;  %v3150_v50 = vmul.f32 %v5708_v17, %v6369_v55  ;;  %v6386_v15 = vld [vmem:[#allocation14_spill] sm:$0xff] }
 0x19b   : > { %v3686_v36 = vadd.f32 %v5702_v56, %v3663_v11  ;;  %v2963_v39 = vadd.f32 %v2916_v58, %v2821_v3  ;;  %v3201_v14 = vrot.slane %v3149_v40, 1  ;;  %v3701_v48 = vmax.f32 %v3685_v1, 0.0 }
 0x19c   : > { %v3042_v63 = vsel %vm3027_vm2, %v3039_v19, %v6382_v8  ;;  %v3088_v60 = vadd.f32 %v3040_v57, %v2962_v44  ;;  %v3202_v24 = vrot.slane %v3150_v50, 1  ;;  %v3274_v46 = vmul.f32 %v5717_v49, %v6368_v37  ;;  %v6383_v19 = vld [vmem:[#allocation12_spill] sm:$0xff]  ;;  %v6385_v44 = vld [vmem:[#allocation18_spill] sm:$0xff] }
 0x19d   : > { %v3702_v59 = vmax.f32 %v3686_v36, 0.0  ;;  %v3089_v42 = vadd.f32 %v3042_v63, %v2963_v39  ;;  %v3275_v21 = vmul.f32 %v5717_v49, %v6369_v55  ;;  %v3398_v3 = vmul.f32 %v5623_v5, %v5218_v4 }
 0x19e   : > { %v3717_v6 = vmin.f32 %v3701_v48, 6.0  ;;  %v3126_v51 = vadd.f32 %v3110_v34, %v3088_v60  ;;  %v3203_v26 = vsel %vm2901_vm0, %v3201_v14, %v3202_v24  ;;  %v6384_v10 = vrot.slane %v6383_v19, 1 }
 0x19f   : > { %v3718_v61 = vmin.f32 %v3702_v59, 6.0  ;;  %v3127_v11 = vadd.f32 %v3111_v23, %v3089_v42  ;;  %v3326_v31 = vrot.slane %v3274_v46, 2  ;;  %v3327_v58 = vrot.slane %v3275_v21, 2 }
 0x1a0   : > { %v3205_v29 = vsel %vm2901_vm0, %v3202_v24, %v6384_v10  ;;  %v3251_v1 = vadd.f32 %v3203_v26, %v3126_v51  ;;  %v3399_v39 = vmul.f32 %v5623_v5, %v6385_v44  ;;  %v6387_v8 = vrot.slane %v6386_v15, 2  ;;  %v6389_v10 = vld [vmem:[#allocation9_spill] sm:$0xff] }
 0x1a1   : > { %v3732_v40 = vpack.c.bf16 %v3718_v61, %v3717_v6  ;;  %v3252_v36 = vadd.f32 %v3205_v29, %v3127_v11  ;;  %v3328_v57 = vsel %vm3027_vm2, %v3326_v31, %v3327_v58  ;;  %v3437_v23 = vmul.f32 %v5732_v33, %v5218_v4  ;;  %v6390_v31 = vld [vmem:[#allocation21_spill] sm:$0xff] }
 0x1a2   : > { %v3330_v34 = vsel %vm3027_vm2, %v3327_v58, %v6387_v8  ;;  %v3438_v63 = vmul.f32 %v5732_v33, %v6385_v44  ;;  %v3376_v50 = vadd.f32 %v3328_v57, %v3251_v1  ;;  %v3562_v48 = vmul.f32 %v5119_v7, %v5218_v4 }
 0x1a3   : > { %4238 = vmatmul.mubr.msk.bf16.vlgmr.msra.gmra.mrb[4].mxu1 %vm3758_vm7, %v3732_v40  ;;  %v3377_v14 = vadd.f32 %v3330_v34, %v3252_v36  ;;  %v3563_v59 = vmul.f32 %v5119_v7, %v6385_v44  ;;  %v3489_v60 = vrot.slane %v3437_v23, 1  ;;  %v2822_v24 = vmul.f32 %v5757_v25, %v6368_v37 }
 0x1a4   : > { %v3490_v42 = vrot.slane %v3438_v63, 1  ;;  %v2823_v46 = vmul.f32 %v5757_v25, %v6369_v55  ;;  %v3414_v21 = vadd.f32 %v3398_v3, %v3376_v50  ;;  %v3614_v61 = vrot.slane %v3562_v48, 2 }
 0x1a5   : > { %v3415_v6 = vadd.f32 %v3399_v39, %v3377_v14  ;;  %v3615_v51 = vrot.slane %v3563_v59, 2  ;;  %v6388_v26 = vrot.slane %v5175_v18, 1  ;;  %v2917_v29 = vrot.slane %v6389_v10, 1  ;;  %v6392_v39 = vld [vmem:[#allocation17_spill] sm:$0xff] }
 0x1a6   : > { %v3491_v11 = vsel %vm2901_vm0, %v3489_v60, %v3490_v42  ;;  %v2965_v58 = vadd.f32 %v6390_v31, %v2823_v46  ;;  %v6391_v57 = vrot.slane %v5193_v2, 2  ;;  %v6393_v15 = vrot.slane %v6392_v39, 1 }
 0x1a7   : > { %v3493_v19 = vsel %vm2901_vm0, %v3490_v42, %v6388_v26  ;;  %v3539_v40 = vadd.f32 %v3491_v11, %v3414_v21  ;;  %v3616_v36 = vsel %vm3027_vm2, %v3614_v61, %v3615_v51  ;;  %v2988_v18 = vmul.f32 %v5565_v22, %v6368_v37 }
 0x1a8   : > { %v3540_v1 = vadd.f32 %v3493_v19, %v3415_v6  ;;  %v3618_v3 = vsel %vm3027_vm2, %v3615_v51, %v6391_v57  ;;  %v2919_v8 = vsel %vm2901_vm0, %v2917_v29, %v6393_v15  ;;  %v2989_v34 = vmul.f32 %v5565_v22, %v6369_v55  ;;  %v6394_v6 = vld [vmem:[#allocation11_spill] sm:$0xff] }
 0x1a9   : > { %v3112_v23 = vmul.f32 %v5684_v32, %v5218_v4  ;;  %v3664_v63 = vadd.f32 %v3616_v36, %v3539_v40  ;;  %v2964_v14 = vadd.f32 %v2919_v8, %v2822_v24  ;;  %v3113_v2 = vmul.f32 %v5684_v32, %v6385_v44 }
 0x1aa   : > { %v3665_v50 = vadd.f32 %v3618_v3, %v3540_v1  ;;  %v3043_v48 = vrot.slane %v2988_v18, 2  ;;  %v3044_v59 = vrot.slane %v2989_v34, 2  ;;  %v3152_v60 = vmul.f32 %v5708_v17, %v5218_v4 }
 0x1ab   : > { %v3153_v37 = vmul.f32 %v5708_v17, %v6385_v44  ;;  %v3687_v42 = vadd.f32 %v5702_v56, %v3664_v63  ;;  %v3277_v46 = vmul.f32 %v5717_v49, %v5218_v4  ;;  %v3278_v24 = vmul.f32 %v5717_v49, %v6385_v44 }
 0x1ac   : > { %v3688_v55 = vadd.f32 %v5702_v56, %v3665_v50  ;;  %v3045_v21 = vsel %vm3027_vm2, %v3043_v48, %v3044_v59  ;;  %v6395_v61 = vrot.slane %v6394_v6, 2  ;;  %v3206_v11 = vrot.slane %v3152_v60, 1  ;;  %v6398_v50 = vld [vmem:[#allocation27_spill] sm:$0xff] }
 0x1ad   : > { %v3207_v26 = vrot.slane %v3153_v37, 1  ;;  %v3703_v19 = vmax.f32 %v3687_v42, 0.0  ;;  %v3090_v29 = vadd.f32 %v3045_v21, %v2964_v14  ;;  %v6396_v1 = vrot.slane %v5160_v45, 1 }
 0x1ae   : > { %v3047_v51 = vsel %vm3027_vm2, %v3044_v59, %v6395_v61  ;;  %v3704_v10 = vmax.f32 %v3688_v55, 0.0  ;;  %v3331_v57 = vrot.slane %v3277_v46, 2  ;;  %v3332_v44 = vrot.slane %v3278_v24, 2 }
 0x1af   : > { %v3091_v31 = vadd.f32 %v3047_v51, %v2965_v58  ;;  %v3208_v40 = vsel %vm2901_vm0, %v3206_v11, %v3207_v26  ;;  %v3210_v36 = vsel %vm2901_vm0, %v3207_v26, %v6396_v1  ;;  %v3719_v3 = vmin.f32 %v3703_v19, 6.0  ;;  %v6399_v19 = vld [vmem:[#allocation23_spill] sm:$0xff] }
 0x1b0   : > { %v3720_v39 = vmin.f32 %v3704_v10, 6.0  ;;  %v3128_v15 = vadd.f32 %v3112_v23, %v3090_v29  ;;  %v3333_v18 = vsel %vm3027_vm2, %v3331_v57, %v3332_v44  ;;  %v6397_v34 = vrot.slane %v5170_v35, 2 }
 0x1b1   : > { %v3129_v8 = vadd.f32 %v3113_v2, %v3091_v31  ;;  %v3400_v58 = vmul.f32 %v5623_v5, %v6398_v50  ;;  %v3401_v45 = vmul.f32 %v5623_v5, %v5323_v20  ;;  %v3440_v60 = vmul.f32 %v5732_v33, %v6398_v50 }
 0x1b2   : > { %v3335_v63 = vsel %vm3027_vm2, %v3332_v44, %v6397_v34  ;;  %v3733_v14 = vpack.c.bf16 %v3720_v39, %v3719_v3  ;;  %v3253_v48 = vadd.f32 %v3208_v40, %v3128_v15  ;;  %v3441_v23 = vmul.f32 %v5732_v33, %v5323_v20  ;;  %v6401_v44 = vld [vmem:[#allocation19_spill] sm:$0xff] }
 0x1b3   : > { %v3254_v59 = vadd.f32 %v3210_v36, %v3129_v8  ;;  %v3565_v35 = vmul.f32 %v5119_v7, %v6398_v50  ;;  %v3566_v2 = vmul.f32 %v5119_v7, %v5323_v20  ;;  %v3567_v37 = vmul.f32 %v5119_v7, %v5325_v43 }
 0x1b4   : > { %4241 = vmatprep.mubr.msk.bf16.mxu1 %vm3758_vm7, %v3733_v14  ;;  %v3378_v42 = vadd.f32 %v3333_v18, %v3253_v48  ;;  %v3494_v46 = vrot.slane %v3440_v60, 1  ;;  %v2824_v24 = vmul.f32 %v5757_v25, %v5218_v4  ;;  %v3495_v21 = vrot.slane %v3441_v23, 1  ;;  %v6405_v60 = vld [vmem:[#allocation22_spill] sm:$0xff] }
 0x1b5   : > { %v3379_v55 = vadd.f32 %v3335_v63, %v3254_v59  ;;  %v3619_v6 = vrot.slane %v3565_v35, 2  ;;  %v3620_v61 = vrot.slane %v3566_v2, 2  ;;  %v3622_v51 = vrot.slane %v3567_v37, 2 }
 0x1b6   : > { %v3416_v11 = vadd.f32 %v3400_v58, %v3378_v42  ;;  %v2922_v10 = vrot.slane %v6399_v19, 1  ;;  %v2991_v29 = vmul.f32 %v5565_v22, %v5218_v4  ;;  %v3496_v7 = vsel %vm2901_vm0, %v3494_v46, %v3495_v21  ;;  %v6403_v58 = vld [vmem:[#allocation20_spill] sm:$0xff]  ;;  %v6406_v19 = vld [vmem:[#allocation35_spill] sm:$0xff] }
 0x1b7   : > { %v3417_v26 = vadd.f32 %v3401_v45, %v3379_v55  ;;  %v6400_v43 = vrot.slane %v5392_v12, 1  ;;  %v3621_v40 = vsel %vm3027_vm2, %v3619_v6, %v3620_v61  ;;  %v3623_v1 = vsel %vm3027_vm2, %v3620_v61, %v3622_v51 }
 0x1b8   : > { %v3541_v36 = vadd.f32 %v3496_v7, %v3416_v11  ;;  %v6402_v3 = vrot.slane %v6401_v44, 1  ;;  %v3048_v15 = vrot.slane %v2991_v29, 2  ;;  %v3114_v4 = vmul.f32 %v5684_v32, %v6398_v50 }
 0x1b9   : > { %v3498_v31 = vsel %vm2901_vm0, %v3495_v21, %v6400_v43  ;;  %v3115_v12 = vmul.f32 %v5684_v32, %v5323_v20  ;;  %v3155_v18 = vmul.f32 %v5708_v17, %v6398_v50  ;;  %v6404_v45 = vrot.slane %v6403_v58, 2 }
 0x1ba   : > { %v3542_v57 = vadd.f32 %v3498_v31, %v3417_v26  ;;  %v2924_v39 = vsel %vm2901_vm0, %v2922_v10, %v6402_v3  ;;  %v3666_v34 = vadd.f32 %v3621_v40, %v3541_v36  ;;  %v3156_v48 = vmul.f32 %v5708_v17, %v5323_v20 }
 0x1bb   : > { %v2966_v8 = vadd.f32 %v2924_v39, %v2824_v24  ;;  %v3050_v14 = vsel %vm3027_vm2, %v3048_v15, %v6404_v45  ;;  %v3131_v23 = vadd.f32 %v3115_v12, %v6405_v60  ;;  %v3211_v35 = vrot.slane %v3155_v18, 1  ;;  %v6408_v39 = vld [vmem:[#allocation37_spill] sm:$0xff]  ;;  %v6410_v45 = vld [vmem:[#allocation24_spill] sm:$0xff] }
 0x1bc   : > { %v3667_v63 = vadd.f32 %v3623_v1, %v3542_v57  ;;  %v3280_v2 = vmul.f32 %v5717_v49, %v6398_v50  ;;  %v3689_v37 = vadd.f32 %v5702_v56, %v3666_v34  ;;  %v3212_v55 = vrot.slane %v3156_v48, 1  ;;  %v5927_v57 = vld [vmem:[%s6218_s3 + $0xa] ss:$0 sm:$0xff] }
 0x1bd   : > { %v3092_v59 = vadd.f32 %v3050_v14, %v2966_v8  ;;  %v3281_v46 = vmul.f32 %v5717_v49, %v5323_v20  ;;  %v3402_v6 = vmul.f32 %v5623_v5, %v5374_v16  ;;  %v3403_v61 = vmul.f32 %v5623_v5, %v5307_v41 }
 0x1be   : > { %v3690_v42 = vadd.f32 %v5702_v56, %v3667_v63  ;;  %v3336_v21 = vrot.slane %v3280_v2, 2  ;;  %v3705_v51 = vmax.f32 %v3689_v37, 0.0  ;;  %v3213_v26 = vsel %vm2901_vm0, %v3211_v35, %v3212_v55  ;;  %v6411_v37 = vld [vmem:[#allocation29_spill] sm:$0xff] }
 0x1bf   : > { %v3130_v24 = vadd.f32 %v3114_v4, %v3092_v59  ;;  %v6407_v10 = vrot.slane %v6406_v19, 1  ;;  %v3337_v31 = vrot.slane %v3281_v46, 2  ;;  %v3443_v20 = vmul.f32 %v5732_v33, %v5374_v16 }
 0x1c0   : > { %v3706_v11 = vmax.f32 %v3690_v42, 0.0  ;;  %v3721_v40 = vmin.f32 %v3705_v51, 6.0  ;;  %v3444_v36 = vmul.f32 %v5732_v33, %v5307_v41  ;;  %v3568_v44 = vmul.f32 %v5927_v57, %v5374_v16 }
 0x1c1   : > { %v3215_v29 = vsel %vm2901_vm0, %v3212_v55, %v6407_v10  ;;  %v3255_v7 = vadd.f32 %v3213_v26, %v3130_v24  ;;  %v3338_v3 = vsel %vm3027_vm2, %v3336_v21, %v3337_v31  ;;  %v6409_v15 = vrot.slane %v6408_v39, 2  ;;  %v6413_v21 = vld [vmem:[#allocation28_spill] sm:$0xff]  ;;  %v6414_v10 = vld [vmem:[#allocation38_spill] sm:$0xff]  ;;  %v6418_v39 = vld [vmem:[#allocation33_spill] sm:$0xff] }
 0x1c2   : > { %v3256_v43 = vadd.f32 %v3215_v29, %v3131_v23  ;;  %v3722_v1 = vmin.f32 %v3706_v11, 6.0  ;;  %v3499_v4 = vrot.slane %v3443_v20, 1  ;;  %v3569_v12 = vmul.f32 %v5927_v57, %v5307_v41  ;;  %v6415_v29 = vld [vmem:[#allocation39_spill] sm:$0xff] }
 0x1c3   : > { %v3340_v8 = vsel %vm3027_vm2, %v3337_v31, %v6409_v15  ;;  %v3380_v34 = vadd.f32 %v3338_v3, %v3255_v7  ;;  %v3500_v58 = vrot.slane %v3444_v36, 1  ;;  %v3570_v14 = vmul.f32 %v5927_v57, %v6410_v45 }
 0x1c4   : > { %v3734_v18 = vpack.c.bf16 %v3722_v1, %v3721_v40  ;;  %v3381_v63 = vadd.f32 %v3340_v8, %v3256_v43  ;;  %v3624_v48 = vrot.slane %v3568_v44, 2  ;;  %v3625_v59 = vrot.slane %v3569_v12, 2  ;;  %v6416_v43 = vld [vmem:[#allocation32_spill] sm:$0xff] }
 0x1c5   : > { %v2826_v60 = vmul.f32 %v5757_v25, %v6398_v50  ;;  %v3418_v23 = vadd.f32 %v3402_v6, %v3380_v34  ;;  %v3501_v2 = vsel %vm2901_vm0, %v3499_v4, %v3500_v58  ;;  %v6412_v42 = vrot.slane %v6411_v37, 1 }
 0x1c6   : > { %4242 = vmatmul.mubr.msk.bf16.gmra.mrb[8].mxu1 %vm3758_vm7, %v3734_v18  ;;  %v3419_v35 = vadd.f32 %v3403_v61, %v3381_v63  ;;  %v3626_v46 = vsel %vm3027_vm2, %v3624_v48, %v3625_v59  ;;  %v3627_v24 = vrot.slane %v3570_v14, 2  ;;  %v2927_v51 = vrot.slane %v6413_v21, 1 }
 0x1c7   : > { %v3503_v55 = vsel %vm2901_vm0, %v3500_v58, %v6412_v42  ;;  %v2994_v11 = vmul.f32 %v5565_v22, %v6398_v50  ;;  %v3543_v26 = vadd.f32 %v3501_v2, %v3418_v23  ;;  %v3095_v6 = vadd.f32 %v6415_v29, %v6414_v10  ;;  %v6422_v29 = vld [vmem:[#allocation26_spill] sm:$0xff] }
 0x1c8   : > { %v3544_v19 = vadd.f32 %v3503_v55, %v3419_v35  ;;  %v3116_v61 = vmul.f32 %v5684_v32, %v5374_v16  ;;  %v3628_v7 = vsel %vm3027_vm2, %v3625_v59, %v3627_v24  ;;  %v6417_v31 = vrot.slane %v6416_v43, 1  ;;  %v6420_v55 = vld [vmem:[#allocation25_spill] sm:$0xff] }
 0x1c9   : > { %v3053_v40 = vrot.slane %v2994_v11, 2  ;;  %v3117_v1 = vmul.f32 %v5684_v32, %v5307_v41  ;;  %v3668_v36 = vadd.f32 %v3626_v46, %v3543_v26  ;;  %v3158_v3 = vmul.f32 %v5708_v17, %v5374_v16 }
 0x1ca   : > { %v2929_v20 = vsel %vm2901_vm0, %v2927_v51, %v6417_v31  ;;  %v3669_v50 = vadd.f32 %v3628_v7, %v3544_v19  ;;  %v6419_v15 = vrot.slane %v6418_v39, 2  ;;  %v3159_v12 = vmul.f32 %v5708_v17, %v5307_v41 }
 0x1cb   : > { %v2968_v44 = vadd.f32 %v2929_v20, %v2826_v60  ;;  %v3133_v4 = vadd.f32 %v3117_v1, %v3095_v6  ;;  %v3283_v18 = vmul.f32 %v5717_v49, %v5374_v16  ;;  %v3691_v34 = vadd.f32 %v5702_v56, %v3668_v36 }
 0x1cc   : > { %v3055_v8 = vsel %vm3027_vm2, %v3053_v40, %v6419_v15  ;;  %v3692_v63 = vadd.f32 %v5702_v56, %v3669_v50  ;;  %v3216_v45 = vrot.slane %v3158_v3, 1  ;;  %v3217_v14 = vrot.slane %v3159_v12, 1 }
 0x1cd   : > { %v3094_v58 = vadd.f32 %v3055_v8, %v2968_v44  ;;  %v3284_v48 = vmul.f32 %v5717_v49, %v5307_v41  ;;  %v3341_v59 = vrot.slane %v3283_v18, 2  ;;  %v3404_v60 = vmul.f32 %v5623_v5, %v5499_v27 }
 0x1ce   : > { %v3707_v23 = vmax.f32 %v3691_v34, 0.0  ;;  %v3708_v35 = vmax.f32 %v3692_v63, 0.0  ;;  %v3405_v37 = vmul.f32 %v5623_v5, %v5580_v62  ;;  %v3218_v42 = vsel %vm2901_vm0, %v3216_v45, %v3217_v14 }
 0x1cf   : > { %v3132_v2 = vadd.f32 %v3116_v61, %v3094_v58  ;;  %v6421_v46 = vrot.slane %v6420_v55, 1  ;;  %v3342_v21 = vrot.slane %v3284_v48, 2  ;;  %v3446_v41 = vmul.f32 %v5732_v33, %v5499_v27 }
 0x1d0   : > { %v3723_v51 = vmin.f32 %v3707_v23, 6.0  ;;  %v3724_v11 = vmin.f32 %v3708_v35, 6.0  ;;  %v6423_v6 = vrot.slane %v6422_v29, 2  ;;  %v3447_v7 = vmul.f32 %v5732_v33, %v5580_v62  ;;  %v6425_v23 = vld [vmem:[#allocation34_spill] sm:$0xff]  ;;  %v6428_v29 = vld [vmem:[#allocation31_spill] sm:$0xff] }
 0x1d1   : > { %v3220_v24 = vsel %vm2901_vm0, %v3217_v14, %v6421_v46  ;;  %v3257_v26 = vadd.f32 %v3218_v42, %v3132_v2  ;;  %v3343_v10 = vsel %vm3027_vm2, %v3341_v59, %v3342_v21  ;;  %v3448_v43 = vmul.f32 %v5732_v33, %v5551_v9 }
 0x1d2   : > { %v3258_v19 = vadd.f32 %v3220_v24, %v3133_v4  ;;  %v3345_v61 = vsel %vm3027_vm2, %v3342_v21, %v6423_v6  ;;  %v3735_v31 = vpack.c.bf16 %v3724_v11, %v3723_v51  ;;  %v3504_v1 = vrot.slane %v3446_v41, 1  ;;  %v6426_v41 = vld [vmem:[#allocation30_spill] sm:$0xff] }
 0x1d3   : > { %v3382_v20 = vadd.f32 %v3343_v10, %v3257_v26  ;;  %v3505_v36 = vrot.slane %v3447_v7, 1  ;;  %v3507_v50 = vrot.slane %v3448_v43, 1  ;;  %v3571_v44 = vmul.f32 %v5927_v57, %v5499_v27 }
 0x1d4   : > { %v3383_v40 = vadd.f32 %v3345_v61, %v3258_v19  ;;  %v3572_v3 = vmul.f32 %v5927_v57, %v5580_v62  ;;  %4245 = vmatprep.mubr.msk.bf16.mxu1 %vm3758_vm7, %v3735_v31  ;;  %v3573_v8 = vmul.f32 %v5927_v57, %v5551_v9  ;;  %v2828_v4 = vmul.f32 %v5757_v25, %v5374_v16 }
 0x1d5   : > { %v3420_v39 = vadd.f32 %v3404_v60, %v3382_v20  ;;  %v3506_v12 = vsel %vm2901_vm0, %v3504_v1, %v3505_v36  ;;  %v3508_v18 = vsel %vm2901_vm0, %v3505_v36, %v3507_v50  ;;  %v3629_v34 = vrot.slane %v3571_v44, 2  ;;  %v6424_v60 = vld [vmem:[#allocation36_spill] sm:$0xff] }
 0x1d6   : > { %v3421_v15 = vadd.f32 %v3405_v37, %v3383_v40  ;;  %v3630_v63 = vrot.slane %v3572_v3, 2  ;;  %v3632_v14 = vrot.slane %v3573_v8, 2  ;;  %v2871_v48 = vmul.f32 %v5540_v47, %v5374_v16  ;;  %v6430_v36 = vld [vmem:[#allocation40_spill] sm:$0xff] }
 0x1d7   : > { %v3545_v58 = vadd.f32 %v3506_v12, %v3420_v39  ;;  %v2997_v9 = vmul.f32 %v5565_v22, %v5374_v16  ;;  %v3097_v35 = vadd.f32 %v6425_v23, %v6424_v60  ;;  %v3118_v2 = vmul.f32 %v5684_v32, %v5499_v27 }
 0x1d8   : > { %v3546_v45 = vadd.f32 %v3508_v18, %v3421_v15  ;;  %v3631_v59 = vsel %vm3027_vm2, %v3629_v34, %v3630_v63  ;;  %v3633_v37 = vsel %vm3027_vm2, %v3630_v63, %v3632_v14  ;;  %v2932_v55 = vrot.slane %v2871_v48, 1 }
 0x1d9   : > { %v3670_v42 = vadd.f32 %v3631_v59, %v3545_v58  ;;  %v3119_v46 = vmul.f32 %v5684_v32, %v5580_v62  ;;  %v3058_v47 = vrot.slane %v2997_v9, 2  ;;  %v3161_v21 = vmul.f32 %v5708_v17, %v5499_v27 }
 0x1da   : > { %v3671_v24 = vadd.f32 %v3633_v37, %v3546_v45  ;;  %v3162_v16 = vmul.f32 %v5708_v17, %v5580_v62  ;;  %v6427_v51 = vrot.slane %v6426_v41, 1  ;;  %v3286_v19 = vmul.f32 %v5717_v49, %v5499_v27 }
 0x1db   : > { %v3693_v22 = vadd.f32 %v5702_v56, %v3670_v42  ;;  %v3135_v26 = vadd.f32 %v3119_v46, %v3097_v35  ;;  %v6429_v6 = vrot.slane %v6428_v29, 2  ;;  %v3221_v7 = vrot.slane %v3161_v21, 1  ;;  %v6438_v21 = vld [vmem:[#allocation47_spill] sm:$0xff] }
 0x1dc   : > { %v2934_v11 = vsel %vm2901_vm0, %v2932_v55, %v6427_v51  ;;  %v3694_v32 = vadd.f32 %v5702_v56, %v3671_v24  ;;  %v3222_v17 = vrot.slane %v3162_v16, 1  ;;  %v3287_v31 = vmul.f32 %v5717_v49, %v5580_v62 }
 0x1dd   : > { %v2970_v10 = vadd.f32 %v2934_v11, %v2828_v4  ;;  %v3060_v61 = vsel %vm3027_vm2, %v3058_v47, %v6429_v6  ;;  %v3709_v43 = vmax.f32 %v3693_v22, 0.0  ;;  %v3346_v20 = vrot.slane %v3286_v19, 2  ;;  %v6445_v6 = vld [vmem:[#allocation50_spill] sm:$0xff] }
 0x1de   : > { %v3710_v40 = vmax.f32 %v3694_v32, 0.0  ;;  %v3406_v50 = vmul.f32 %v5623_v5, %v6430_v36  ;;  %v3407_v27 = vmul.f32 %v5623_v5, %v5533_v0  ;;  %v3223_v3 = vsel %vm2901_vm0, %v3221_v7, %v3222_v17  ;;  %v6443_v32 = vld [vmem:[#allocation43_spill] sm:$0xff]  ;;  %v6447_v7 = vld [vmem:[#allocation48_spill] sm:$0xff] }
 0x1df   : > { %v3096_v1 = vadd.f32 %v3060_v61, %v2970_v10  ;;  %v3725_v44 = vmin.f32 %v3709_v43, 6.0  ;;  %v6431_v39 = vrot.slane %v5584_v38, 1  ;;  %v3347_v8 = vrot.slane %v3287_v31, 2 }
 0x1e0   : > { %v3726_v4 = vmin.f32 %v3710_v40, 6.0  ;;  %v3449_v18 = vmul.f32 %v5732_v33, %v6430_v36  ;;  %v6432_v63 = vrot.slane %v5591_v54, 2  ;;  %v3450_v45 = vmul.f32 %v5732_v33, %v5533_v0 }
 0x1e1   : > { %v3225_v15 = vsel %vm2901_vm0, %v3222_v17, %v6431_v39  ;;  %v3134_v12 = vadd.f32 %v3118_v2, %v3096_v1  ;;  %v3348_v34 = vsel %vm3027_vm2, %v3346_v20, %v3347_v8  ;;  %v3574_v38 = vmul.f32 %v5927_v57, %v6430_v36 }
 0x1e2   : > { %v3260_v49 = vadd.f32 %v3225_v15, %v3135_v26  ;;  %v3350_v58 = vsel %vm3027_vm2, %v3347_v8, %v6432_v63  ;;  %v3736_v14 = vpack.c.bf16 %v3726_v4, %v3725_v44  ;;  %v3509_v9 = vrot.slane %v3449_v18, 1  ;;  %v6453_v15 = vld [vmem:[#allocation45_spill] sm:$0xff] }
 0x1e3   : > { %v3259_v48 = vadd.f32 %v3223_v3, %v3134_v12  ;;  %v3510_v60 = vrot.slane %v3450_v45, 1  ;;  %v3575_v23 = vmul.f32 %v5927_v57, %v5533_v0  ;;  %v3634_v35 = vrot.slane %v3574_v38, 2 }
 0x1e4   : > { %v3385_v59 = vadd.f32 %v3350_v58, %v3260_v49  ;;  %v2831_v54 = vmul.f32 %v5757_v25, %v5580_v62  ;;  %4246 = vmatmul.mubr.msk.bf16.gmra.mrb[12].mxu1 %vm3758_vm7, %v3736_v14  ;;  %v6433_v33 = vrot.slane %v5569_v30, 2  ;;  %v6434_v42 = vrot.slane %v5597_v53, 2  ;;  %v6439_v53 = vld [vmem:[#allocation41_spill] sm:$0xff] }
 0x1e5   : > { %v3384_v2 = vadd.f32 %v3348_v34, %v3259_v48  ;;  %v6435_v46 = vrot.slane %v5661_v28, 1  ;;  %v6436_v24 = vrot.slane %v5643_v13, 1  ;;  %v3511_v57 = vsel %vm2901_vm0, %v3509_v9, %v3510_v60  ;;  %v6442_v13 = vld [vmem:[#allocation51_spill] sm:$0xff]  ;;  %v6449_v28 = vld [vmem:[#allocation42_spill] sm:$0xff]  ;;  %v6454_v49 = vld [vmem:[#allocation49_spill] sm:$0xff] }
 0x1e6   : > { %v3423_v37 = vadd.f32 %v3407_v27, %v3385_v59  ;;  %v3067_v55 = vsel %vm3027_vm2, %v6434_v42, %v6433_v33  ;;  %v6437_v62 = vrot.slane %v5514_v52, 1  ;;  %v3635_v47 = vrot.slane %v3575_v23, 2  ;;  %v6452_v27 = vld [vmem:[#allocation44_spill] sm:$0xff]  ;;  %v6455_v34 = vld [vmem:[#allocation46_spill] sm:$0xff]  ;;  %v4311_v33 = vld [vmem:[%s4488_s15 + $0x18] sm:$0xf] }
 0x1e7   : > { %v3516_v0 = vsel %vm2901_vm0, %v6436_v24, %v6435_v46  ;;  %v2973_v16 = vadd.f32 %v6438_v21, %v2831_v54  ;;  %v3422_v30 = vadd.f32 %v3406_v50, %v3384_v2  ;;  %v6440_v41 = vrot.slane %v6439_v53, 1  ;;  %v4313_v24 = vld [vmem:[%s4488_s15 + $0xc] sm:$0xf] }
 0x1e8   : > { %v3513_v25 = vsel %vm2901_vm0, %v3510_v60, %v6437_v62  ;;  %v6441_v51 = vmov %v6435_v46  ;;  %v3549_v26 = vadd.f32 %v3516_v0, %v6442_v13  ;;  %v3636_v19 = vsel %vm3027_vm2, %v3634_v35, %v3635_v47  ;;  %v4315_v62 = vld [vmem:[%s4488_s15 + $0x20] sm:$0x1] }
 0x1e9   : > { %v3548_v22 = vadd.f32 %v3513_v25, %v3423_v37  ;;  %v3518_v11 = vsel %vm2901_vm0, %v6441_v51, %v6440_v41  ;;  %v6444_v10 = vrot.slane %v6443_v32, 2  ;;  %v3099_v29 = vadd.f32 %v3067_v55, %v2973_v16  ;;  %v4312_v55 = vld [vmem:[%s4488_s15 + $0x1c] sm:$0xf]  ;;  %v6111_v41 = vld [vmem:[%s6221_s6] ss:$0 sm:$0xff] }
 0x1ea   : > { %v6446_v61 = vrot.slane %v6445_v6, 2  ;;  %v6448_v43 = vrot.slane %v6447_v7, 2  ;;  %v3547_v31 = vadd.f32 %v3511_v57, %v3422_v30  ;;  %v6450_v40 = vrot.slane %v6449_v28, 2 }
 0x1eb   : > { %v3638_v52 = vsel %vm3027_vm2, %v3635_v47, %v6444_v10  ;;  %v3137_v44 = vadd.f32 %v6452_v27, %v3099_v29  ;;  %v3409_v18 = vmul.f32 %v5623_v5, %v6454_v49  ;;  %v3887_v42 = vunpack.c.l.bf16 %v4311_v33  ;;  %v4316_v47 = vld [vmem:[%s4488_s15 + $0x14] sm:$0x1] }
 0x1ec   : > { %v3641_v17 = vsel %vm3027_vm2, %v6448_v43, %v6446_v61  ;;  %v3673_v20 = vadd.f32 %v3638_v52, %v3548_v22  ;;  %v6451_v1 = vmov %v6446_v61  ;;  %v3672_v3 = vadd.f32 %v3636_v19, %v3547_v31 }
 0x1ed   : > { %v3643_v36 = vsel %vm3027_vm2, %v6451_v1, %v6450_v40  ;;  %v3674_v50 = vadd.f32 %v3641_v17, %v3549_v26  ;;  %v3262_v8 = vadd.f32 %v6453_v15, %v3137_v44  ;;  %v3888_v46 = vunpack.c.l.bf16 %v4312_v55  ;;  %v4317_v1 = vld [vmem:[%s4488_s15 + $0x30] sm:$0xf]  ;;  %v4319_v44 = vld [vmem:[%s4488_s15 + $0x24] sm:$0xf] }
 0x1ee   : > { %v3696_v39 = vadd.f32 %v5702_v56, %v3673_v20  ;;  %v3695_v4 = vadd.f32 %v5702_v56, %v3672_v3  ;;  %v3884_v0 = vunpack.c.l.bf16 %v4313_v24  ;;  %v3889_v25 = vunpack.c.l.bf16 %v4315_v62 }
 0x1ef   : > { %v3387_v63 = vadd.f32 %v6455_v34, %v3262_v8  ;;  %v3697_v14 = vadd.f32 %v5702_v56, %v3674_v50  ;;  %v3886_v21 = vunpack.c.l.bf16 %v4316_v47  ;;  %v3937_v16 = vrot.slane %v3887_v42, 1  ;;  %v4318_v50 = vld [vmem:[%s4488_s15 + $0x34] sm:$0xf]  ;;  %v4321_v8 = vld [vmem:[%s4488_s15 + $0x38] sm:$0x1] }
 0x1f0   : > { %v3712_v12 = vmax.f32 %v3696_v39, 0.0  ;;  %v3711_v58 = vmax.f32 %v3695_v4, 0.0  ;;  %v3938_v30 = vrot.slane %v3888_v46, 1  ;;  %v3932_v22 = vrot.slane %v3884_v0, 1  ;;  %v4320_v39 = vld [vmem:[%s4488_s15 + $0x28] sm:$0xf] }
 0x1f1   : > { %v3425_v38 = vadd.f32 %v3409_v18, %v3387_v63  ;;  %v3713_v23 = vmax.f32 %v3697_v14, 0.0  ;;  %v3940_v51 = vrot.slane %v3889_v25, 1  ;;  %v3894_v27 = vunpack.c.l.bf16 %v4318_v50  ;;  %v4323_v0 = vld [vmem:[%s4488_s15 + $0x48] sm:$0xf]  ;;  %v4325_v25 = vld [vmem:[%s4488_s15 + $0x3c] sm:$0xf] }
 0x1f2   : > { %v3728_v45 = vmin.f32 %v3712_v12, 6.0  ;;  %v3727_v48 = vmin.f32 %v3711_v58, 6.0  ;;  %v3939_v26 = vsel %vm2901_vm0, %v3937_v16, %v3938_v30  ;;  %v3890_v3 = vunpack.c.l.bf16 %v4319_v44  ;;  %v4322_v12 = vld [vmem:[%s4488_s15 + $0x2c] sm:$0x1] }
 0x1f3   : > { %v3550_v59 = vadd.f32 %v3518_v11, %v3425_v38  ;;  %v3729_v54 = vmin.f32 %v3713_v23, 6.0  ;;  %v3935_v11 = vrot.slane %v3886_v21, 1  ;;  %v3941_v6 = vsel %vm2901_vm0, %v3938_v30, %v3940_v51  ;;  %v4326_v21 = vld [vmem:[%s4488_s15 + $0x40] sm:$0xf]  ;;  %v4327_v30 = vld [vmem:[%s4488_s15 + $0x50] sm:$0x1] }
 0x1f4   : > { %v3737_v9 = vpack.c.bf16 %v3728_v45, %v3727_v48  ;;  %v3891_v15 = vunpack.c.l.bf16 %v4320_v39  ;;  %v3895_v4 = vunpack.c.l.bf16 %v4321_v8  ;;  %v3892_v49 = vunpack.c.l.bf16 %v4322_v12 }
 0x1f5   : > { %v3675_v60 = vadd.f32 %v3643_v36, %v3550_v59  ;;  %v3893_v36 = vunpack.c.l.bf16 %v4317_v1  ;;  %v3948_v34 = vrot.slane %v3894_v27, 1  ;;  %v3942_v63 = vrot.slane %v3890_v3, 1  ;;  %v4329_v3 = vld [vmem:[%s4488_s15 + $0x60] sm:$0xf] }
 0x1f6   : > { %4249 = vmatprep.mubr.msk.bf16.mxu1 %vm3758_vm7, %v3737_v9  ;;  %v3943_v58 = vrot.slane %v3891_v15, 1  ;;  %v3950_v45 = vrot.slane %v3895_v4, 1  ;;  %v3945_v38 = vrot.slane %v3892_v49, 1  ;;  %v3896_v47 = vunpack.c.l.bf16 %v4325_v25  ;;  %v4330_v15 = vld [vmem:[%s4488_s15 + $0x64] sm:$0xf] }
 0x1f7   : > { %v3698_v5 = vadd.f32 %v5702_v56, %v3675_v60  ;;  %v4314_v56 = vld [vmem:[%s4488_s15 + $0x10] sm:$0xf]  ;;  %v3947_v18 = vrot.slane %v3893_v36, 1  ;;  %v3897_v16 = vunpack.c.l.bf16 %v4326_v21  ;;  %v3905_v39 = vunpack.c.l.bf16 %v4329_v3  ;;  %v4331_v4 = vld [vmem:[%s4488_s15 + $0x54] sm:$0xf] }
 0x1f8   : > { %v3885_v57 = vunpack.c.l.bf16 %v4314_v56  ;;  %v3944_v60 = vsel %vm2901_vm0, %v3942_v63, %v3943_v58  ;;  %v3946_v33 = vsel %vm2901_vm0, %v3943_v58, %v3945_v38  ;;  %v3899_v56 = vunpack.c.l.bf16 %v4323_v0  ;;  %v4332_v49 = vld [vmem:[%s4488_s15 + $0x58] sm:$0xf]  ;;  %v4334_v58 = vld [vmem:[%s4488_s15 + $0x5c] sm:$0x1] }
 0x1f9   : > { %v3714_v35 = vmax.f32 %v3698_v5, 0.0  ;;  %v3949_v48 = vsel %vm2901_vm0, %v3947_v18, %v3948_v34  ;;  %v3906_v8 = vunpack.c.l.bf16 %v4330_v15  ;;  %v3902_v12 = vunpack.c.l.bf16 %v4331_v4 }
 0x1fa   : > { %v3933_v53 = vrot.slane %v3885_v57, 1  ;;  %v4324_v57 = vld [vmem:[%s4488_s15 + $0x4c] sm:$0xf]  ;;  %v3903_v18 = vunpack.c.l.bf16 %v4332_v49  ;;  %v3967_v38 = vrot.slane %v3905_v39, 1 }
 0x1fb   : > { %v3730_v2 = vmin.f32 %v3714_v35, 6.0  ;;  %v3951_v35 = vsel %vm2901_vm0, %v3948_v34, %v3950_v45  ;;  %v3900_v62 = vunpack.c.l.bf16 %v4324_v57  ;;  %v4333_v34 = vld [vmem:[%s4488_s15 + $0x68] sm:$0x1]  ;;  %v3904_v45 = vunpack.c.l.bf16 %v4334_v58 }
 0x1fc   : > { %v3934_v10 = vsel %vm2901_vm0, %v3932_v22, %v3933_v53  ;;  %v3936_v17 = vsel %vm2901_vm0, %v3933_v53, %v3935_v11  ;;  %v3901_v22 = vunpack.c.l.bf16 %v4327_v30  ;;  %v4328_v53 = vld [vmem:[%s4488_s15 + $0x44] sm:$0x1]  ;;  %v3957_v11 = vrot.slane %v3899_v56, 1 }
 0x1fd   : > { %v3738_v37 = vpack.c.bf16 %v3730_v2, %v3729_v54  ;;  %v3898_v51 = vunpack.c.l.bf16 %v4328_v53  ;;  %v3907_v63 = vunpack.c.l.bf16 %v4333_v34 }
 0x1ff   : > { %4250 = vmatmul.mubr.msk.bf16.gmra.mrb[16].mxu1 %vm3758_vm7, %v3738_v37 }
 0x276   : > { %v4239_v13 = vpop.f32.mrb[4].mxu1 }
 0x277   : > { %v3830_v19 = vadd.f32 %v4239_v13, %v6111_v41  ;;  %v3821_v32 = vpop.f32.mrb[5].mxu1  ;;  %v3958_v13 = vrot.slane %v3900_v62, 1 }
 0x278   : > { %v3822_v52 = vadd.f32 %v6111_v41, %v3821_v32  ;;  %v4240_v29 = vpop.f32.mrb[6].mxu1  ;;  %v3960_v32 = vrot.slane %v3901_v22, 1 }
 0x279   : > { %v3990_v61 = vadd.f32 %v3939_v26, %v3830_v19  ;;  %v3833_v7 = vadd.f32 %v4240_v29, %v6111_v41  ;;  %v3824_v43 = vpop.f32.mrb[7].mxu1  ;;  %v3952_v26 = vrot.slane %v3896_v47, 1  ;;  %v3953_v19 = vrot.slane %v3897_v16, 1 }
 0x27a   : > { %v3988_v31 = vadd.f32 %v3934_v10, %v3822_v52  ;;  %v3825_v20 = vadd.f32 %v6111_v41, %v3824_v43  ;;  %v3955_v10 = vrot.slane %v3898_v51, 1  ;;  %v3959_v29 = vsel %vm2901_vm0, %v3957_v11, %v3958_v13 }
 0x27b   : > { %4006 = vst.msk [vmem:[%s6119_s20 + $0x10] sm:$0xff] %vm1551_vm1, %v3990_v61  ;;  %v3991_v28 = vadd.f32 %v3941_v6, %v3833_v7  ;;  %v3954_v7 = vsel %vm2901_vm0, %v3952_v26, %v3953_v19 }
 0x27c   : > { %4004 = vst.msk [vmem:[%s6119_s20] sm:$0xff] %vm1551_vm1, %v3988_v31  ;;  %v3989_v40 = vadd.f32 %v3936_v17, %v3825_v20  ;;  %v3961_v31 = vsel %vm2901_vm0, %v3958_v13, %v3960_v32  ;;  %v3956_v1 = vsel %vm2901_vm0, %v3953_v19, %v3955_v10 }
 0x27d   : > { %4007 = vst.msk [vmem:[%s6119_s20 + $0x18] sm:$0xff] %vm1551_vm1, %v3991_v28 }
 0x27e   : > { %4005 = vst.msk [vmem:[%s6119_s20 + $0x8] sm:$0xff] %vm1551_vm1, %v3989_v40 }
 0x299   : > { %v4243_v14 = vpop.f32.mrb[8].mxu1 }
 0x29a   : > { %v3846_v59 = vadd.f32 %v4243_v14, %v6111_v41  ;;  %v3837_v9 = vpop.f32.mrb[9].mxu1  ;;  %v3968_v14 = vrot.slane %v3906_v8, 1 }
 0x29b   : > { %v3838_v23 = vadd.f32 %v6111_v41, %v3837_v9  ;;  %v4244_v5 = vpop.f32.mrb[10].mxu1  ;;  %v3970_v9 = vrot.slane %v3907_v63, 1 }
 0x29c   : > { %v3994_v54 = vadd.f32 %v3949_v48, %v3846_v59  ;;  %v3849_v2 = vadd.f32 %v4244_v5, %v6111_v41  ;;  %v3840_v37 = vpop.f32.mrb[11].mxu1  ;;  %v3962_v48 = vrot.slane %v3902_v12, 1  ;;  %v3963_v59 = vrot.slane %v3903_v18, 1 }
 0x29d   : > { %v3992_v42 = vadd.f32 %v3944_v60, %v3838_v23  ;;  %v3841_v55 = vadd.f32 %v6111_v41, %v3840_v37  ;;  %v3965_v60 = vrot.slane %v3904_v45, 1  ;;  %v3969_v5 = vsel %vm2901_vm0, %v3967_v38, %v3968_v14 }
 0x29e   : > { %4010 = vst.msk [vmem:[%s6119_s20 + $0x30] sm:$0xff] %vm1551_vm1, %v3994_v54  ;;  %v3995_v46 = vadd.f32 %v3951_v35, %v3849_v2  ;;  %v3964_v2 = vsel %vm2901_vm0, %v3962_v48, %v3963_v59 }
 0x29f   : > { %4008 = vst.msk [vmem:[%s6119_s20 + $0x20] sm:$0xff] %vm1551_vm1, %v3992_v42  ;;  %v3993_v24 = vadd.f32 %v3946_v33, %v3841_v55  ;;  %v3971_v42 = vsel %vm2901_vm0, %v3968_v14, %v3970_v9  ;;  %v3966_v0 = vsel %vm2901_vm0, %v3963_v59, %v3965_v60 }
 0x2a0   : > { %4011 = vst.msk [vmem:[%s6119_s20 + $0x38] sm:$0xff] %vm1551_vm1, %v3995_v46 }
 0x2a1   : > { %4009 = vst.msk [vmem:[%s6119_s20 + $0x28] sm:$0xff] %vm1551_vm1, %v3993_v24 }
 0x2b7   : > { %v4247_v52 = vpop.f32.mrb[12].mxu1 }
 0x2b8   : > { %v3862_v6 = vadd.f32 %v4247_v52, %v6111_v41  ;;  %v3853_v61 = vpop.f32.mrb[13].mxu1 }
 0x2b9   : > { %v3854_v43 = vadd.f32 %v6111_v41, %v3853_v61  ;;  %v4248_v17 = vpop.f32.mrb[14].mxu1 }
 0x2ba   : > { %v3998_v20 = vadd.f32 %v3959_v29, %v3862_v6  ;;  %v3865_v28 = vadd.f32 %v4248_v17, %v6111_v41  ;;  %v3856_v40 = vpop.f32.mrb[15].mxu1 }
 0x2bb   : > { %v3996_v36 = vadd.f32 %v3954_v7, %v3854_v43  ;;  %v3857_v50 = vadd.f32 %v6111_v41, %v3856_v40 }
 0x2bc   : > { %4014 = vst.msk [vmem:[%s6119_s20 + $0x50] sm:$0xff] %vm1551_vm1, %v3998_v20  ;;  %v3999_v27 = vadd.f32 %v3961_v31, %v3865_v28 }
 0x2bd   : > { %4012 = vst.msk [vmem:[%s6119_s20 + $0x40] sm:$0xff] %vm1551_vm1, %v3996_v36  ;;  %v3997_v44 = vadd.f32 %v3956_v1, %v3857_v50 }
 0x2be   : > { %4015 = vst.msk [vmem:[%s6119_s20 + $0x58] sm:$0xff] %vm1551_vm1, %v3999_v27 }
 0x2bf   : > { %4013 = vst.msk [vmem:[%s6119_s20 + $0x48] sm:$0xff] %vm1551_vm1, %v3997_v44 }
 0x2d2   : > { %v4251_v23 = vpop.f32.mrb[16].mxu1 }
 0x2d3   : > { %v3878_v35 = vadd.f32 %v4251_v23, %v6111_v41  ;;  %v3869_v54 = vpop.f32.mrb[17].mxu1 }
 0x2d4   : > { %v3870_v37 = vadd.f32 %v6111_v41, %v3869_v54  ;;  %v4252_v33 = vpop.f32.mrb[18].mxu1 }
 0x2d5   : > { %v4002_v55 = vadd.f32 %v3969_v5, %v3878_v35  ;;  %v3881_v46 = vadd.f32 %v4252_v33, %v6111_v41  ;;  %v3872_v24 = vpop.f32.mrb[19].mxu1 }
 0x2d6   : > { %v4000_v56 = vadd.f32 %v3964_v2, %v3870_v37  ;;  %v3873_v57 = vadd.f32 %v6111_v41, %v3872_v24 }
 0x2d7   : > { %4018 = vst.msk [vmem:[%s6119_s20 + $0x70] sm:$0xff] %vm1551_vm1, %v4002_v55  ;;  %v4003_v62 = vadd.f32 %v3971_v42, %v3881_v46 }
 0x2d8   : > { %4016 = vst.msk [vmem:[%s6119_s20 + $0x60] sm:$0xff] %vm1551_vm1, %v4000_v56  ;;  %v4001_v25 = vadd.f32 %v3966_v0, %v3873_v57 }
 0x2d9   : > { %4019 = vst.msk [vmem:[%s6119_s20 + $0x78] sm:$0xff] %vm1551_vm1, %v4003_v62 }
 0x2da   : > { %4017 = vst.msk [vmem:[%s6119_s20 + $0x68] sm:$0xff] %vm1551_vm1, %v4001_v25 }
 0x2db PF: > { %s17_s28 = sadd.s32 1, %s4397_s28   ;;  %s6456_s24 = smov %s4389_s26 }
 0x2dc   : > { %p14_p7 = scmp.ge.s32.totalorder %s17_s28, 6   ;;  %s6457_s25 = smov %s4393_s27 }
 0x2dd   : > { %s6458_s26 = smov %s6461_s29  ;;  %s6459_s27 = smov %s6465_s30 }
 0x2de   :  { %16 = sbr.rel (!%p14_p7) target bundleno = 3 (0x3), region = 81 }

</bundles_post_ra>
